<compile_context>
chip_gen: v7x
topology: tpu7x:2x2x1
jax: 0.10.0
libtpu: 0.0.40
codegen_flags: <defaults>
</compile_context>

<pallas_src>
import functools

import numpy as np

import jax
import jax.numpy as jnp
from jax import lax
from jax.experimental import pallas as pl
from jax.experimental.pallas import tpu as pltpu


def _round_up(n, m):
    return (n + m - 1) // m * m


def _sgm_kernel(nfreq, out_size, is_large,
                x_ref,
                w0_ref, b0_ref,
                w1a_ref, b1a_ref, w1b_ref, b1b_ref,
                w2a_ref, b2a_ref, w2b_ref, b2b_ref,
                w2c_ref, b2c_ref,
                g_ref, gt_ref,
                o_ref):
    bf16 = jnp.bfloat16
    f32 = jnp.float32

    def dense(a, w_ref, b_ref):
        # bf16 matmul inputs, f32 accumulation, f32 bias add.
        return (jnp.dot(a.astype(bf16), w_ref[...], preferred_element_type=f32)
                + b_ref[...])

    x = x_ref[...]                                          # (bt, 8) f32

    # lay_init: Linear(7->256) (K padded to 8) + ReLU
    h = jnp.maximum(dense(x, w0_ref, b0_ref), 0.0)

    if is_large:
        # layers1: Linear(256,256) -> ReLU -> Linear(256,256); residual + ReLU
        res = h
        t = jnp.maximum(dense(h, w1a_ref, b1a_ref), 0.0)
        t = dense(t, w1b_ref, b1b_ref)
        h = jnp.maximum(t + res, 0.0)

    # layers2: Linear(256,512)+ReLU -> Linear(512,1024)+ReLU -> [Dropout]
    #          -> Linear(1024, out)
    h = jnp.maximum(dense(h, w2a_ref, b2a_ref), 0.0)
    h = jnp.maximum(dense(h, w2b_ref, b2b_ref), 0.0)
    # Dropout(0.5): identity at inference.
    # TODO(synk): training-mode dropout (stochastic masking) not implemented.

    # Fused final projection: (bt, 1024) @ (1024, out_pad), lane-dense.
    z = dense(h, w2c_ref, b2c_ref)                          # (bt, out_pad) f32

    # Per-ROI normalization over the frequency axis, lane-dense via thin 0/1
    # segment matrices (bf16 exact for 0/1 values; f32 accumulation).
    g = g_ref[...]                                          # (out_pad, nroi_pad) bf16
    gt = gt_ref[...]                                        # (nroi_pad, out_pad) bf16

    inv_n = 1.0 / float(nfreq)
    # Unbiased std, like torch.std; nfreq == 1 deliberately yields NaN.
    inv_nm1 = (1.0 / float(nfreq - 1)) if nfreq > 1 else float("nan")

    mu_roi = jnp.dot(z.astype(bf16), g, preferred_element_type=f32) * inv_n
    mu = jnp.dot(mu_roi.astype(bf16), gt, preferred_element_type=f32)
    d = z - mu
    ssq_roi = jnp.dot((d * d).astype(bf16), g, preferred_element_type=f32)
    std_roi = jnp.sqrt(ssq_roi * inv_nm1)                   # finite (>= 0), incl. padded ROIs
    std = jnp.dot(std_roi.astype(bf16), gt, preferred_element_type=f32)

    # Padded lanes (columns >= out_size) carry d == 0 and std == 0; add 1
    # there so the padded slab stores exact 0.0 instead of 0 * inf = NaN.
    out_pad = o_ref.shape[-1]
    pad_one = (lax.broadcasted_iota(jnp.int32, (1, out_pad), 1)
               >= out_size).astype(f32)
    o_ref[...] = (d / (std + pad_one)).astype(o_ref.dtype)


def _uniform(key, shape, fan_in, dtype=jnp.float32):
    bound = 1.0 / float(fan_in) ** 0.5
    return jax.random.uniform(key, shape, jnp.float32,
                              minval=-bound, maxval=bound).astype(dtype)


def init_params(key, nroi, nfreq):
    out_size = nroi * nfreq
    ks = jax.random.split(key, 12)
    bf = jnp.bfloat16
    # Weights (in_features, out_features) in bf16; biases in f32.
    return {
        "w0":  _uniform(ks[0], (7, 256), 7, bf),
        "b0":  _uniform(ks[1], (1, 256), 7),
        "w1a": _uniform(ks[2], (256, 256), 256, bf),
        "b1a": _uniform(ks[3], (1, 256), 256),
        "w1b": _uniform(ks[4], (256, 256), 256, bf),
        "b1b": _uniform(ks[5], (1, 256), 256),
        "w2a": _uniform(ks[6], (256, 512), 256, bf),
        "b2a": _uniform(ks[7], (1, 512), 256),
        "w2b": _uniform(ks[8], (512, 1024), 512, bf),
        "b2b": _uniform(ks[9], (1, 1024), 512),
        "w2c": _uniform(ks[10], (1024, out_size), 1024, bf),
        "b2c": _uniform(ks[11], (1, out_size), 1024),
    }


@functools.lru_cache(maxsize=None)
def _roi_segment_matrices(nroi, nfreq):
    """Thin 0/1 ROI-segment matrices G, G^T, built once per (nroi, nfreq)."""
    out_size = nroi * nfreq
    out_pad = _round_up(out_size, 128)
    nroi_pad = _round_up(nroi, 128)
    j = np.arange(out_pad)[:, None]
    r = np.arange(nroi_pad)[None, :]
    g = (((j // nfreq) == r) & (j < out_size) & (r < nroi)).astype(np.float32)
    return (jnp.asarray(g, dtype=jnp.bfloat16),
            jnp.asarray(np.ascontiguousarray(g.T), dtype=jnp.bfloat16))


def sgmnet_forward(x, params, nroi, nfreq, is_large=True, batch_tile=512,
                   out_dtype=jnp.float32):
    """batch_tile: 512-1024 is a good default on v6e/v7x; ~256 suffices on v5e."""
    B = x.shape[0]
    out_size = nroi * nfreq
    out_pad = _round_up(out_size, 128)                  # lane-dense output stores
    nroi_pad = _round_up(nroi, 128)

    # Batch tiling: amortize the ~0.35 us per-grid-step overhead with large
    # tiles, but keep >= 2 grid steps for medium B so ("parallel",) spans both
    # v7x TensorCores.
    if B > batch_tile:
        bt = batch_tile
    else:
        bt = _round_up(max((B + 1) // 2, 1), 8)
    bt = max(8, min(bt, _round_up(B, 8)))
    B_pad = _round_up(B, bt)

    # ---- wrapper-side glue (layout/padding only) ----
    x_p = jnp.pad(x.astype(jnp.float32), ((0, B_pad - B), (0, 1)))     # (B_pad, 8)
    w0 = jnp.pad(params["w0"], ((0, 1), (0, 0)))                       # (8, 256)
    w2c = jnp.pad(params["w2c"], ((0, 0), (0, out_pad - out_size)))
    b2c = jnp.pad(params["b2c"], ((0, 0), (0, out_pad - out_size)))
    g, gt = _roi_segment_matrices(nroi, nfreq)                          # cached

    kernel = functools.partial(_sgm_kernel, nfreq, out_size, is_large)

    def _const(shape):
        # Constant-index operands: fetched once, single-buffered (saves VMEM).
        return pl.BlockSpec(shape, lambda i: (0,) * len(shape),
                            pipeline_mode=pl.Buffered(1))

    in_specs = [
        pl.BlockSpec((bt, 8), lambda i: (i, 0)),                        # x
        _const((8, 256)), _const((1, 256)),                             # lay_init
        _const((256, 256)), _const((1, 256)),                           # layers1[0]
        _const((256, 256)), _const((1, 256)),                           # layers1[2]
        _const((256, 512)), _const((1, 512)),                           # layers2[0]
        _const((512, 1024)), _const((1, 1024)),                         # layers2[2]
        _const((1024, out_pad)), _const((1, out_pad)),                  # layers2[5]
        _const((out_pad, nroi_pad)), _const((nroi_pad, out_pad)),       # G, G^T
    ]
    out_specs = pl.BlockSpec((bt, out_pad), lambda i: (i, 0))

    out_bpe = jnp.dtype(out_dtype).itemsize
    # VMEM footprint: single-buffered weights/constants + double-buffered
    # x / output tiles + live f32 activations; cap at 3/4 of physical VMEM
    # (v7x only has 64 MiB; v5e/v6e have 128 MiB).
    weight_bytes = 2 * (8 * 256 + 2 * 256 * 256 + 256 * 512 + 512 * 1024
                        + 1024 * out_pad + 2 * out_pad * nroi_pad)
    bias_bytes = 4 * (3 * 256 + 512 + 1024 + out_pad)
    io_bytes = 2 * (bt * 8 * 4 + bt * out_pad * out_bpe)
    act_bytes = bt * 4 * (2 * 256 + 512 + 1024 + 3 * out_pad + 2 * nroi_pad)
    footprint = weight_bytes + bias_bytes + io_bytes + act_bytes
    try:
        phys_vmem = int(pltpu.get_tpu_info().vmem_capacity_bytes)
    except Exception:
        phys_vmem = 64 * 1024 * 1024
    vmem_limit = int(min(phys_vmem * 3 // 4,
                         max(32 * 1024 * 1024, int(footprint * 1.5))))

    flops = 2 * B_pad * (8 * 256
                         + (2 * 256 * 256 if is_large else 0)
                         + 256 * 512 + 512 * 1024 + 1024 * out_pad
                         + 4 * out_pad * nroi_pad)
    cost = pl.CostEstimate(
        flops=int(flops),
        transcendentals=int(B_pad * (nroi_pad + out_pad)),
        bytes_accessed=int(B_pad * 8 * 4 + B_pad * out_pad * out_bpe
                           + weight_bytes + bias_bytes),
    )

    y2d = pl.pallas_call(
        kernel,
        out_shape=jax.ShapeDtypeStruct((B_pad, out_pad), out_dtype),
        grid_spec=pltpu.PrefetchScalarGridSpec(
            num_scalar_prefetch=0,
            grid=(B_pad // bt,),
            in_specs=in_specs,
            out_specs=out_specs,
        ),
        compiler_params=pltpu.CompilerParams(
            dimension_semantics=("parallel",),
            vmem_limit_bytes=vmem_limit,
        ),
        cost_estimate=cost,
    )(x_p, w0, params["b0"],
      params["w1a"], params["b1a"], params["w1b"], params["b1b"],
      params["w2a"], params["b2a"], params["w2b"], params["b2b"],
      w2c, b2c, g, gt)

    return y2d[:B, :out_size].reshape(B, nroi, nfreq)


def sgmnet_reference(x, params, nroi, nfreq, is_large=True):
    """Pure-JAX reference mirroring the PyTorch forward (eval mode), with the
    same bf16-matmul / f32-accumulate precision as the kernel's MLP body."""
    bf16 = jnp.bfloat16

    def dot(a, w):
        return jnp.dot(a.astype(bf16), w, preferred_element_type=jnp.float32)

    h = jnp.maximum(dot(x, params["w0"]) + params["b0"], 0.0)
    if is_large:
        res = h
        t = jnp.maximum(dot(h, params["w1a"]) + params["b1a"], 0.0)
        t = dot(t, params["w1b"]) + params["b1b"]
        h = jnp.maximum(t + res, 0.0)
    h = jnp.maximum(dot(h, params["w2a"]) + params["b2a"], 0.0)
    h = jnp.maximum(dot(h, params["w2b"]) + params["b2b"], 0.0)
    y = (dot(h, params["w2c"]) + params["b2c"]).reshape(-1, nroi, nfreq)
    mu = y.mean(axis=-1, keepdims=True)
    var = jnp.sum((y - mu) ** 2, axis=-1, keepdims=True) / (nfreq - 1)
    return (y - mu) / jnp.sqrt(var)


if __name__ == "__main__":
    nroi, nfreq = 4, 8
    B = 8

    key = jax.random.PRNGKey(0)
    kx, kp = jax.random.split(key)
    x = jax.random.normal(kx, (B, 7), jnp.float32)
    params = init_params(kp, nroi, nfreq)

    out = sgmnet_forward(x, params, nroi, nfreq, is_large=True)
    out = jax.block_until_ready(out)

    ref = sgmnet_reference(x, params, nroi, nfreq, is_large=True)
    assert out.shape == (B, nroi, nfreq)
    assert bool(jnp.all(jnp.isfinite(out))), "non-finite values in output"
    assert jnp.allclose(out, ref, atol=2e-2, rtol=2e-2), "mismatch vs reference"

    print("KERNEL_OK")
</pallas_src>

<mosaic_0001>
module attributes {stable_mosaic.version = 11 : i64} {
  func.func @_sgm_kernel(%arg0: i32, %arg1: memref<8x8xf32, #tpu.memory_space<vmem>>, %arg2: memref<8x256xbf16, #tpu.memory_space<vmem>>, %arg3: memref<1x256xf32, #tpu.memory_space<vmem>>, %arg4: memref<256x256xbf16, #tpu.memory_space<vmem>>, %arg5: memref<1x256xf32, #tpu.memory_space<vmem>>, %arg6: memref<256x256xbf16, #tpu.memory_space<vmem>>, %arg7: memref<1x256xf32, #tpu.memory_space<vmem>>, %arg8: memref<256x512xbf16, #tpu.memory_space<vmem>>, %arg9: memref<1x512xf32, #tpu.memory_space<vmem>>, %arg10: memref<512x1024xbf16, #tpu.memory_space<vmem>>, %arg11: memref<1x1024xf32, #tpu.memory_space<vmem>>, %arg12: memref<1024x128xbf16, #tpu.memory_space<vmem>>, %arg13: memref<1x128xf32, #tpu.memory_space<vmem>>, %arg14: memref<128x128xbf16, #tpu.memory_space<vmem>>, %arg15: memref<128x128xbf16, #tpu.memory_space<vmem>>, %arg16: memref<8x128xf32, #tpu.memory_space<vmem>>) attributes {dimension_semantics = [#tpu.dimension_semantics<parallel>], iteration_bounds = array<i64: 1>, scalar_prefetch = 0 : i64, scratch_operands = 0 : i64, tpu.core_type = #tpu.core_type<tc>, window_params = [{transform_indices = @transform_0, window_bounds = array<i64: 8, 8>}, {pipeline_mode = #tpu.pipeline_mode<synchronous>, transform_indices = @transform_1, window_bounds = array<i64: 8, 256>}, {pipeline_mode = #tpu.pipeline_mode<synchronous>, transform_indices = @transform_2, window_bounds = array<i64: 1, 256>}, {pipeline_mode = #tpu.pipeline_mode<synchronous>, transform_indices = @transform_3, window_bounds = array<i64: 256, 256>}, {pipeline_mode = #tpu.pipeline_mode<synchronous>, transform_indices = @transform_4, window_bounds = array<i64: 1, 256>}, {pipeline_mode = #tpu.pipeline_mode<synchronous>, transform_indices = @transform_5, window_bounds = array<i64: 256, 256>}, {pipeline_mode = #tpu.pipeline_mode<synchronous>, transform_indices = @transform_6, window_bounds = array<i64: 1, 256>}, {pipeline_mode = #tpu.pipeline_mode<synchronous>, transform_indices = @transform_7, window_bounds = array<i64: 256, 512>}, {pipeline_mode = #tpu.pipeline_mode<synchronous>, transform_indices = @transform_8, window_bounds = array<i64: 1, 512>}, {pipeline_mode = #tpu.pipeline_mode<synchronous>, transform_indices = @transform_9, window_bounds = array<i64: 512, 1024>}, {pipeline_mode = #tpu.pipeline_mode<synchronous>, transform_indices = @transform_10, window_bounds = array<i64: 1, 1024>}, {pipeline_mode = #tpu.pipeline_mode<synchronous>, transform_indices = @transform_11, window_bounds = array<i64: 1024, 128>}, {pipeline_mode = #tpu.pipeline_mode<synchronous>, transform_indices = @transform_12, window_bounds = array<i64: 1, 128>}, {pipeline_mode = #tpu.pipeline_mode<synchronous>, transform_indices = @transform_13, window_bounds = array<i64: 128, 128>}, {pipeline_mode = #tpu.pipeline_mode<synchronous>, transform_indices = @transform_14, window_bounds = array<i64: 128, 128>}, {transform_indices = @transform_15, window_bounds = array<i64: 8, 128>}]} {
    %c0 = arith.constant 0 : index
    %c0_0 = arith.constant 0 : index
    %0 = vector.load %arg1[%c0, %c0_0] : memref<8x8xf32, #tpu.memory_space<vmem>>, vector<8x8xf32>
    %1 = arith.truncf %0 : vector<8x8xf32> to vector<8x8xbf16>
    %c0_1 = arith.constant 0 : index
    %c0_2 = arith.constant 0 : index
    %2 = vector.load %arg2[%c0_1, %c0_2] : memref<8x256xbf16, #tpu.memory_space<vmem>>, vector<8x256xbf16>
    %cst = arith.constant dense<0.000000e+00> : vector<8x256xf32>
    %3 = tpu.matmul %1, %2, %cst {dimension_numbers = #tpu.dot_dimension_numbers<[1], [0], [0], [1], [0, 0, 1, 1], [], []>} : vector<8x8xbf16>, vector<8x256xbf16>, vector<8x256xf32> -> vector<8x256xf32>
    %c0_3 = arith.constant 0 : index
    %c0_4 = arith.constant 0 : index
    %4 = vector.load %arg3[%c0_3, %c0_4] : memref<1x256xf32, #tpu.memory_space<vmem>>, vector<1x256xf32>
    %5 = vector.broadcast %4 : vector<1x256xf32> to vector<8x256xf32>
    %6 = arith.addf %3, %5 : vector<8x256xf32>
    %cst_5 = arith.constant 0.000000e+00 : f32
    %7 = vector.broadcast %cst_5 : f32 to vector<8x256xf32>
    %8 = arith.maximumf %6, %7 : vector<8x256xf32>
    %9 = arith.truncf %8 : vector<8x256xf32> to vector<8x256xbf16>
    %c0_6 = arith.constant 0 : index
    %c0_7 = arith.constant 0 : index
    %10 = vector.load %arg4[%c0_6, %c0_7] : memref<256x256xbf16, #tpu.memory_space<vmem>>, vector<256x256xbf16>
    %cst_8 = arith.constant dense<0.000000e+00> : vector<8x256xf32>
    %11 = tpu.matmul %9, %10, %cst_8 {dimension_numbers = #tpu.dot_dimension_numbers<[1], [0], [0], [1], [0, 0, 1, 1], [], []>} : vector<8x256xbf16>, vector<256x256xbf16>, vector<8x256xf32> -> vector<8x256xf32>
    %c0_9 = arith.constant 0 : index
    %c0_10 = arith.constant 0 : index
    %12 = vector.load %arg5[%c0_9, %c0_10] : memref<1x256xf32, #tpu.memory_space<vmem>>, vector<1x256xf32>
    %13 = vector.broadcast %12 : vector<1x256xf32> to vector<8x256xf32>
    %14 = arith.addf %11, %13 : vector<8x256xf32>
    %cst_11 = arith.constant 0.000000e+00 : f32
    %15 = vector.broadcast %cst_11 : f32 to vector<8x256xf32>
    %16 = arith.maximumf %14, %15 : vector<8x256xf32>
    %17 = arith.truncf %16 : vector<8x256xf32> to vector<8x256xbf16>
    %c0_12 = arith.constant 0 : index
    %c0_13 = arith.constant 0 : index
    %18 = vector.load %arg6[%c0_12, %c0_13] : memref<256x256xbf16, #tpu.memory_space<vmem>>, vector<256x256xbf16>
    %cst_14 = arith.constant dense<0.000000e+00> : vector<8x256xf32>
    %19 = tpu.matmul %17, %18, %cst_14 {dimension_numbers = #tpu.dot_dimension_numbers<[1], [0], [0], [1], [0, 0, 1, 1], [], []>} : vector<8x256xbf16>, vector<256x256xbf16>, vector<8x256xf32> -> vector<8x256xf32>
    %c0_15 = arith.constant 0 : index
    %c0_16 = arith.constant 0 : index
    %20 = vector.load %arg7[%c0_15, %c0_16] : memref<1x256xf32, #tpu.memory_space<vmem>>, vector<1x256xf32>
    %21 = vector.broadcast %20 : vector<1x256xf32> to vector<8x256xf32>
    %22 = arith.addf %19, %21 : vector<8x256xf32>
    %23 = arith.addf %22, %8 : vector<8x256xf32>
    %cst_17 = arith.constant 0.000000e+00 : f32
    %24 = vector.broadcast %cst_17 : f32 to vector<8x256xf32>
    %25 = arith.maximumf %23, %24 : vector<8x256xf32>
    %26 = arith.truncf %25 : vector<8x256xf32> to vector<8x256xbf16>
    %c0_18 = arith.constant 0 : index
    %c0_19 = arith.constant 0 : index
    %27 = vector.load %arg8[%c0_18, %c0_19] : memref<256x512xbf16, #tpu.memory_space<vmem>>, vector<256x512xbf16>
    %cst_20 = arith.constant dense<0.000000e+00> : vector<8x512xf32>
    %28 = tpu.matmul %26, %27, %cst_20 {dimension_numbers = #tpu.dot_dimension_numbers<[1], [0], [0], [1], [0, 0, 1, 1], [], []>} : vector<8x256xbf16>, vector<256x512xbf16>, vector<8x512xf32> -> vector<8x512xf32>
    %c0_21 = arith.constant 0 : index
    %c0_22 = arith.constant 0 : index
    %29 = vector.load %arg9[%c0_21, %c0_22] : memref<1x512xf32, #tpu.memory_space<vmem>>, vector<1x512xf32>
    %30 = vector.broadcast %29 : vector<1x512xf32> to vector<8x512xf32>
    %31 = arith.addf %28, %30 : vector<8x512xf32>
    %cst_23 = arith.constant 0.000000e+00 : f32
    %32 = vector.broadcast %cst_23 : f32 to vector<8x512xf32>
    %33 = arith.maximumf %31, %32 : vector<8x512xf32>
    %34 = arith.truncf %33 : vector<8x512xf32> to vector<8x512xbf16>
    %c0_24 = arith.constant 0 : index
    %c0_25 = arith.constant 0 : index
    %35 = vector.load %arg10[%c0_24, %c0_25] : memref<512x1024xbf16, #tpu.memory_space<vmem>>, vector<512x1024xbf16>
    %cst_26 = arith.constant dense<0.000000e+00> : vector<8x1024xf32>
    %36 = tpu.matmul %34, %35, %cst_26 {dimension_numbers = #tpu.dot_dimension_numbers<[1], [0], [0], [1], [0, 0, 1, 1], [], []>} : vector<8x512xbf16>, vector<512x1024xbf16>, vector<8x1024xf32> -> vector<8x1024xf32>
    %c0_27 = arith.constant 0 : index
    %c0_28 = arith.constant 0 : index
    %37 = vector.load %arg11[%c0_27, %c0_28] : memref<1x1024xf32, #tpu.memory_space<vmem>>, vector<1x1024xf32>
    %38 = vector.broadcast %37 : vector<1x1024xf32> to vector<8x1024xf32>
    %39 = arith.addf %36, %38 : vector<8x1024xf32>
    %cst_29 = arith.constant 0.000000e+00 : f32
    %40 = vector.broadcast %cst_29 : f32 to vector<8x1024xf32>
    %41 = arith.maximumf %39, %40 : vector<8x1024xf32>
    %42 = arith.truncf %41 : vector<8x1024xf32> to vector<8x1024xbf16>
    %c0_30 = arith.constant 0 : index
    %c0_31 = arith.constant 0 : index
    %43 = vector.load %arg12[%c0_30, %c0_31] : memref<1024x128xbf16, #tpu.memory_space<vmem>>, vector<1024x128xbf16>
    %cst_32 = arith.constant dense<0.000000e+00> : vector<8x128xf32>
    %44 = tpu.matmul %42, %43, %cst_32 {dimension_numbers = #tpu.dot_dimension_numbers<[1], [0], [0], [1], [0, 0, 1, 1], [], []>} : vector<8x1024xbf16>, vector<1024x128xbf16>, vector<8x128xf32> -> vector<8x128xf32>
    %c0_33 = arith.constant 0 : index
    %c0_34 = arith.constant 0 : index
    %45 = vector.load %arg13[%c0_33, %c0_34] : memref<1x128xf32, #tpu.memory_space<vmem>>, vector<1x128xf32>
    %46 = vector.broadcast %45 : vector<1x128xf32> to vector<8x128xf32>
    %47 = arith.addf %44, %46 : vector<8x128xf32>
    %c0_35 = arith.constant 0 : index
    %c0_36 = arith.constant 0 : index
    %48 = vector.load %arg14[%c0_35, %c0_36] : memref<128x128xbf16, #tpu.memory_space<vmem>>, vector<128x128xbf16>
    %c0_37 = arith.constant 0 : index
    %c0_38 = arith.constant 0 : index
    %49 = vector.load %arg15[%c0_37, %c0_38] : memref<128x128xbf16, #tpu.memory_space<vmem>>, vector<128x128xbf16>
    %50 = arith.truncf %47 : vector<8x128xf32> to vector<8x128xbf16>
    %cst_39 = arith.constant dense<0.000000e+00> : vector<8x128xf32>
    %51 = tpu.matmul %50, %48, %cst_39 {dimension_numbers = #tpu.dot_dimension_numbers<[1], [0], [0], [1], [0, 0, 1, 1], [], []>} : vector<8x128xbf16>, vector<128x128xbf16>, vector<8x128xf32> -> vector<8x128xf32>
    %cst_40 = arith.constant 1.250000e-01 : f32
    %52 = vector.broadcast %cst_40 : f32 to vector<8x128xf32>
    %53 = arith.mulf %51, %52 : vector<8x128xf32>
    %54 = arith.truncf %53 : vector<8x128xf32> to vector<8x128xbf16>
    %cst_41 = arith.constant dense<0.000000e+00> : vector<8x128xf32>
    %55 = tpu.matmul %54, %49, %cst_41 {dimension_numbers = #tpu.dot_dimension_numbers<[1], [0], [0], [1], [0, 0, 1, 1], [], []>} : vector<8x128xbf16>, vector<128x128xbf16>, vector<8x128xf32> -> vector<8x128xf32>
    %56 = arith.subf %47, %55 : vector<8x128xf32>
    %57 = arith.mulf %56, %56 : vector<8x128xf32>
    %58 = arith.truncf %57 : vector<8x128xf32> to vector<8x128xbf16>
    %cst_42 = arith.constant dense<0.000000e+00> : vector<8x128xf32>
    %59 = tpu.matmul %58, %48, %cst_42 {dimension_numbers = #tpu.dot_dimension_numbers<[1], [0], [0], [1], [0, 0, 1, 1], [], []>} : vector<8x128xbf16>, vector<128x128xbf16>, vector<8x128xf32> -> vector<8x128xf32>
    %cst_43 = arith.constant 0.142857149 : f32
    %60 = vector.broadcast %cst_43 : f32 to vector<8x128xf32>
    %61 = arith.mulf %59, %60 : vector<8x128xf32>
    %62 = math.sqrt %61 : vector<8x128xf32>
    %63 = arith.truncf %62 : vector<8x128xf32> to vector<8x128xbf16>
    %cst_44 = arith.constant dense<0.000000e+00> : vector<8x128xf32>
    %64 = tpu.matmul %63, %49, %cst_44 {dimension_numbers = #tpu.dot_dimension_numbers<[1], [0], [0], [1], [0, 0, 1, 1], [], []>} : vector<8x128xbf16>, vector<128x128xbf16>, vector<8x128xf32> -> vector<8x128xf32>
    %65 = tpu.iota {dimensions = array<i32: 1>} : vector<1x128xi32>
    %c32_i32 = arith.constant 32 : i32
    %66 = vector.broadcast %c32_i32 : i32 to vector<1x128xi32>
    %67 = arith.cmpi sge, %65, %66 : vector<1x128xi32>
    %68 = arith.extui %67 : vector<1x128xi1> to vector<1x128xi32>
    %69 = arith.sitofp %68 : vector<1x128xi32> to vector<1x128xf32>
    %70 = vector.broadcast %69 : vector<1x128xf32> to vector<8x128xf32>
    %71 = arith.addf %64, %70 : vector<8x128xf32>
    %72 = arith.divf %56, %71 : vector<8x128xf32>
    %c0_45 = arith.constant 0 : index
    %c0_46 = arith.constant 0 : index
    %73 = vector.load %arg16[%c0_45, %c0_46] : memref<8x128xf32, #tpu.memory_space<vmem>>, vector<8x128xf32>
    tpu.vector_store %arg16[%c0_45, %c0_46], %72 {strides = array<i32>} : memref<8x128xf32, #tpu.memory_space<vmem>>, vector<8x128xf32>,
    return
  }
  func.func @transform_0(%arg0: i32) -> (i32, i32) {
    %c0_i32 = arith.constant 0 : i32
    %c0_i32_0 = arith.constant 0 : i32
    return %arg0, %c0_i32 : i32, i32
  }
  func.func @transform_1(%arg0: i32) -> (i32, i32) {
    %c0_i32 = arith.constant 0 : i32
    %c0_i32_0 = arith.constant 0 : i32
    %c0_i32_1 = arith.constant 0 : i32
    return %c0_i32, %c0_i32_0 : i32, i32
  }
  func.func @transform_2(%arg0: i32) -> (i32, i32) {
    %c0_i32 = arith.constant 0 : i32
    %c0_i32_0 = arith.constant 0 : i32
    %c0_i32_1 = arith.constant 0 : i32
    return %c0_i32, %c0_i32_0 : i32, i32
  }
  func.func @transform_3(%arg0: i32) -> (i32, i32) {
    %c0_i32 = arith.constant 0 : i32
    %c0_i32_0 = arith.constant 0 : i32
    %c0_i32_1 = arith.constant 0 : i32
    return %c0_i32, %c0_i32_0 : i32, i32
  }
  func.func @transform_4(%arg0: i32) -> (i32, i32) {
    %c0_i32 = arith.constant 0 : i32
    %c0_i32_0 = arith.constant 0 : i32
    %c0_i32_1 = arith.constant 0 : i32
    return %c0_i32, %c0_i32_0 : i32, i32
  }
  func.func @transform_5(%arg0: i32) -> (i32, i32) {
    %c0_i32 = arith.constant 0 : i32
    %c0_i32_0 = arith.constant 0 : i32
    %c0_i32_1 = arith.constant 0 : i32
    return %c0_i32, %c0_i32_0 : i32, i32
  }
  func.func @transform_6(%arg0: i32) -> (i32, i32) {
    %c0_i32 = arith.constant 0 : i32
    %c0_i32_0 = arith.constant 0 : i32
    %c0_i32_1 = arith.constant 0 : i32
    return %c0_i32, %c0_i32_0 : i32, i32
  }
  func.func @transform_7(%arg0: i32) -> (i32, i32) {
    %c0_i32 = arith.constant 0 : i32
    %c0_i32_0 = arith.constant 0 : i32
    %c0_i32_1 = arith.constant 0 : i32
    return %c0_i32, %c0_i32_0 : i32, i32
  }
  func.func @transform_8(%arg0: i32) -> (i32, i32) {
    %c0_i32 = arith.constant 0 : i32
    %c0_i32_0 = arith.constant 0 : i32
    %c0_i32_1 = arith.constant 0 : i32
    return %c0_i32, %c0_i32_0 : i32, i32
  }
  func.func @transform_9(%arg0: i32) -> (i32, i32) {
    %c0_i32 = arith.constant 0 : i32
    %c0_i32_0 = arith.constant 0 : i32
    %c0_i32_1 = arith.constant 0 : i32
    return %c0_i32, %c0_i32_0 : i32, i32
  }
  func.func @transform_10(%arg0: i32) -> (i32, i32) {
    %c0_i32 = arith.constant 0 : i32
    %c0_i32_0 = arith.constant 0 : i32
    %c0_i32_1 = arith.constant 0 : i32
    return %c0_i32, %c0_i32_0 : i32, i32
  }
  func.func @transform_11(%arg0: i32) -> (i32, i32) {
    %c0_i32 = arith.constant 0 : i32
    %c0_i32_0 = arith.constant 0 : i32
    %c0_i32_1 = arith.constant 0 : i32
    return %c0_i32, %c0_i32_0 : i32, i32
  }
  func.func @transform_12(%arg0: i32) -> (i32, i32) {
    %c0_i32 = arith.constant 0 : i32
    %c0_i32_0 = arith.constant 0 : i32
    %c0_i32_1 = arith.constant 0 : i32
    return %c0_i32, %c0_i32_0 : i32, i32
  }
  func.func @transform_13(%arg0: i32) -> (i32, i32) {
    %c0_i32 = arith.constant 0 : i32
    %c0_i32_0 = arith.constant 0 : i32
    %c0_i32_1 = arith.constant 0 : i32
    return %c0_i32, %c0_i32_0 : i32, i32
  }
  func.func @transform_14(%arg0: i32) -> (i32, i32) {
    %c0_i32 = arith.constant 0 : i32
    %c0_i32_0 = arith.constant 0 : i32
    %c0_i32_1 = arith.constant 0 : i32
    return %c0_i32, %c0_i32_0 : i32, i32
  }
  func.func @transform_15(%arg0: i32) -> (i32, i32) {
    %c0_i32 = arith.constant 0 : i32
    %c0_i32_0 = arith.constant 0 : i32
    return %arg0, %c0_i32 : i32, i32
  }
}

</mosaic_0001>

<bundles_post_ra>
// kernel: tpu_custom_call.1
= control target key start
LH: loop header
LB: loop body
LE: loop exit
PB: predicated region body
PF: predicated region fallthrough
CT: control target
= control target key end

     0   :  { %20 = vsyncpa [#allocation3], 0  ;;  %s5871_s0 = inlined_call_operand.hbm [shape: f32[8,8], index: 0, kind: input, shape index: {}]   ;;  %s5872_s1 = inlined_call_operand.hbm [shape: bf16[8,256], index: 1, kind: input, shape index: {}]   ;;  %s5873_s2 = inlined_call_operand.vmem [shape: f32[1,256], index: 2, kind: input, shape index: {}]   ;;  %s5874_s3 = inlined_call_operand.hbm [shape: bf16[256,256], index: 3, kind: input, shape index: {}]   ;;  %s5875_s4 = inlined_call_operand.hbm [shape: f32[1,256], index: 4, kind: input, shape index: {}]   ;;  %s5876_s5 = inlined_call_operand.hbm [shape: bf16[256,256], index: 5, kind: input, shape index: {}]   ;;  %s5877_s6 = inlined_call_operand.vmem [shape: f32[1,256], index: 6, kind: input, shape index: {}]   ;;  %s5878_s7 = inlined_call_operand.hbm [shape: bf16[256,512], index: 7, kind: input, shape index: {}]   ;;  %s5879_s8 = inlined_call_operand.vmem [shape: f32[1,512], index: 8, kind: input, shape index: {}]   ;;  %s5880_s9 = inlined_call_operand.hbm [shape: bf16[512,1024], index: 9, kind: input, shape index: {}]   ;;  %s5881_s10 = inlined_call_operand.vmem [shape: f32[1,1024], index: 10, kind: input, shape index: {}]   ;;  %s5882_s11 = inlined_call_operand.hbm [shape: bf16[1024,128], index: 11, kind: input, shape index: {}]   ;;  %s5883_s12 = inlined_call_operand.vmem [shape: f32[1,128], index: 12, kind: input, shape index: {}]   ;;  %s5884_s13 = inlined_call_operand.hbm [shape: bf16[128,128], index: 13, kind: input, shape index: {}]   ;;  %s5885_s14 = inlined_call_operand.hbm [shape: bf16[128,128], index: 14, kind: input, shape index: {}]   ;;  %s5886_s15 = inlined_call_operand.hbm [shape: f32[8,128], index: 15, kind: output, shape index: {}]  }
   0x1   :  { %21 = vsyncpa [#allocation6], 0 }
   0x2   :  { %22 = vsyncpa [#allocation9], 0 }
   0x3   :  { %23 = vsyncpa [#allocation12], 0 }
   0x4   :  { %24 = vsyncpa [#allocation15], 0 }
   0x5   :  { %25 = vsyncpa [#allocation18], 0 }
   0x6   :  { %26 = vsyncpa [#allocation4], 0  ;;  %s5440_s18 = smov [#allocation5]   ;;  %s5441_s20 = smov [#allocation8]  }
   0x7   :  { %s43_s19 = sshll.u32 %s5440_s18, 4  ;;  %s67_s21 = sshll.u32 %s5441_s20, 4  ;;  %s44_s19 = int_to_ptr.vmem [resolvable:$true] %s43_s19  ;;  %s68_s21 = int_to_ptr.vmem [resolvable:$true] %s67_s21 }
   0x8   :  { %s5184_s24 = scalar_lea.hbm %s5872_s1, 128 }
   0x9   :  { %p5185_p0 = scmp.ne.s32.totalorder %s5872_s1, %s5184_s24  ;;  %p5188_p1 = scmp.lt.u32.totalorder %s5184_s24, %s5872_s1 }
   0xb   :  { %p5190_p2 = pnand %p5188_p1, %p5185_p0 }
   0xd   :  { %5193 = shalt.err (!%p5190_p2)
}
   0xe   :  { %s5194_s29 = scalar_lea.vmem %s44_s19, 128  ;;  %p5199_p4 = scmp.lt.s32.totalorder %s44_s19, %s44_s19 }
   0xf   :  { %p5195_p3 = scmp.ne.s32.totalorder %s44_s19, %s5194_s29  ;;  %p5200_p5 = scmp.lt.s32.totalorder %s5194_s29, %s5194_s29 }
  0x11   :  { %p5201_p6 = por %p5200_p5, %p5199_p4 }
  0x13   :  { %p5202_p7 = pnand %p5201_p6, %p5195_p3 }
  0x15   :  { %5205 = shalt.err (!%p5202_p7)
}
  0x16   :  { %46 = dma.hbm_to_vmem [thread:$0]  %s5872_s1, 128, %s44_s19, [#allocation6]  }
  0x17   :  { %s5206_s20 = scalar_lea.hbm %s5875_s4, 32 }
  0x18   :  { %p5207_p8 = scmp.ne.s32.totalorder %s5875_s4, %s5206_s20  ;;  %p5210_p9 = scmp.lt.u32.totalorder %s5206_s20, %s5875_s4 }
  0x1a   :  { %p5212_p10 = pnand %p5210_p9, %p5207_p8 }
  0x1c   :  { %5215 = shalt.err (!%p5212_p10)
}
  0x1d   :  { %s5216_s26 = scalar_lea.vmem %s68_s21, 32  ;;  %p5221_p12 = scmp.lt.s32.totalorder %s68_s21, %s68_s21 }
  0x1e   :  { %p5217_p11 = scmp.ne.s32.totalorder %s68_s21, %s5216_s26  ;;  %p5222_p13 = scmp.lt.s32.totalorder %s5216_s26, %s5216_s26 }
  0x20   :  { %p5223_p0 = por %p5222_p13, %p5221_p12 }
  0x22   :  { %p5224_p1 = pnand %p5223_p0, %p5217_p11 }
  0x24   :  { %5227 = shalt.err (!%p5224_p1)
}
  0x25   :  { %70 = dma.hbm_to_vmem [thread:$0]  %s5875_s4, 32, %s68_s21, [#allocation9]  }
  0x26   :  { %s5442_s27 = smov [#allocation11]   ;;  %s5228_s16 = scalar_lea.hbm %s5878_s7, 8192 }
  0x27   :  { %s90_s28 = sshll.u32 %s5442_s27, 4  ;;  %p5229_p2 = scmp.ne.s32.totalorder %s5878_s7, %s5228_s16  ;;  %s91_s28 = int_to_ptr.vmem [resolvable:$true] %s90_s28 }
  0x28   :  { %p5232_p3 = scmp.lt.u32.totalorder %s5228_s16, %s5878_s7 }
  0x2a   :  { %p5234_p4 = pnand %p5232_p3, %p5229_p2 }
  0x2c   :  { %5237 = shalt.err (!%p5234_p4)
}
  0x2d   :  { %s5238_s23 = scalar_lea.vmem %s91_s28, 8192  ;;  %p5243_p6 = scmp.lt.s32.totalorder %s91_s28, %s91_s28 }
  0x2e   :  { %p5239_p5 = scmp.ne.s32.totalorder %s91_s28, %s5238_s23  ;;  %p5244_p7 = scmp.lt.s32.totalorder %s5238_s23, %s5238_s23 }
  0x30   :  { %p5245_p8 = por %p5244_p7, %p5243_p6 }
  0x32   :  { %p5246_p9 = pnand %p5245_p8, %p5239_p5 }
  0x34   :  { %5249 = shalt.err (!%p5246_p9)
}
  0x35   :  { %s5443_s4 = smov 256   ;;  %s5444_s21 = smov 16  }
  0x36   :  { %96 = dma.hbm_to_vmem [thread:$0]  %s5878_s7, 8192, %s91_s28, [#allocation12], %s5443_s4, %s5443_s4, %s5444_s21  }
  0x37   :  { %s5445_s26 = smov [#allocation14]   ;;  %s5250_s29 = scalar_lea.hbm %s5882_s11, 8192 }
  0x38   :  { %s118_s1 = sshll.u32 %s5445_s26, 4  ;;  %p5251_p10 = scmp.ne.s32.totalorder %s5882_s11, %s5250_s29  ;;  %s119_s1 = int_to_ptr.vmem [resolvable:$true] %s118_s1 }
  0x39   :  { %p5254_p11 = scmp.lt.u32.totalorder %s5250_s29, %s5882_s11 }
  0x3b   :  { %p5256_p12 = pnand %p5254_p11, %p5251_p10 }
  0x3d   :  { %5259 = shalt.err (!%p5256_p12)
}
  0x3e   :  { %s5260_s20 = scalar_lea.vmem %s119_s1, 8192  ;;  %p5265_p0 = scmp.lt.s32.totalorder %s119_s1, %s119_s1 }
  0x3f   :  { %p5261_p13 = scmp.ne.s32.totalorder %s119_s1, %s5260_s20  ;;  %p5266_p1 = scmp.lt.s32.totalorder %s5260_s20, %s5260_s20 }
  0x41   :  { %p5267_p2 = por %p5266_p1, %p5265_p0 }
  0x43   :  { %p5268_p3 = pnand %p5267_p2, %p5261_p13 }
  0x45   :  { %5271 = shalt.err (!%p5268_p3)
}
  0x46   :  { %s5446_s7 = smov 64   ;;  %s5447_s28 = smov 4  }
  0x47   :  { %124 = dma.hbm_to_vmem [thread:$0]  %s5882_s11, 8192, %s119_s1, [#allocation15], %s5446_s7, %s5446_s7, %s5447_s28  }
  0x48   :  { %s5448_s4 = smov [#allocation2]   ;;  %s5449_s24 = smov [#allocation7]  }
  0x49   :  { %s33_s21 = sshll.u32 %s5448_s4, 4  ;;  %s54_s25 = sshll.u32 %s5449_s24, 4  ;;  %s34_s21 = int_to_ptr.vmem [resolvable:$true] %s33_s21  ;;  %s5593_s25 = int_to_ptr.vmem [resolvable:$true] %s54_s25 }
  0x4a   :  { %s5272_s27 = scalar_lea.hbm %s5871_s0, 128 }
  0x4b   :  { %p5273_p4 = scmp.ne.s32.totalorder %s5871_s0, %s5272_s27  ;;  %p5276_p5 = scmp.lt.u32.totalorder %s5272_s27, %s5871_s0 }
  0x4d   :  { %p5278_p6 = pnand %p5276_p5, %p5273_p4 }
  0x4f   :  { %5281 = shalt.err (!%p5278_p6)
}
  0x50   :  { %s5282_s11 = scalar_lea.vmem %s34_s21, 128  ;;  %p5287_p8 = scmp.lt.s32.totalorder %s34_s21, %s34_s21 }
  0x51   :  { %p5283_p7 = scmp.ne.s32.totalorder %s34_s21, %s5282_s11  ;;  %p5288_p9 = scmp.lt.s32.totalorder %s5282_s11, %s5282_s11 }
  0x53   :  { %p5289_p10 = por %p5288_p9, %p5287_p8 }
  0x55   :  { %p5290_p11 = pnand %p5289_p10, %p5283_p7 }
  0x57   :  { %5293 = shalt.err (!%p5290_p11)
}
  0x58   :  { %36 = dma.hbm_to_vmem [thread:$0]  %s5871_s0, 128, %s34_s21, [#allocation3]  }
  0x59   :  { %s5294_s23 = scalar_lea.hbm %s5874_s3, 4096 }
  0x5a   :  { %p5295_p12 = scmp.ne.s32.totalorder %s5874_s3, %s5294_s23  ;;  %p5298_p13 = scmp.lt.u32.totalorder %s5294_s23, %s5874_s3 }
  0x5c   :  { %p5300_p0 = pnand %p5298_p13, %p5295_p12 }
  0x5e   :  { %5303 = shalt.err (!%p5300_p0)
}
  0x5f   :  { %s5304_s27 = scalar_lea.vmem %s5593_s25, 4096  ;;  %p5309_p2 = scmp.lt.s32.totalorder %s5593_s25, %s5593_s25 }
  0x60   :  { %p5305_p1 = scmp.ne.s32.totalorder %s5593_s25, %s5304_s27  ;;  %p5310_p3 = scmp.lt.s32.totalorder %s5304_s27, %s5304_s27 }
  0x62   :  { %p5311_p4 = por %p5310_p3, %p5309_p2 }
  0x64   :  { %p5312_p5 = pnand %p5311_p4, %p5305_p1 }
  0x66   :  { %5315 = shalt.err (!%p5312_p5)
}
  0x67   :  { %s5450_s0 = smov 128   ;;  %s5451_s21 = smov 8  }
  0x68   :  { %60 = dma.hbm_to_vmem [thread:$0]  %s5874_s3, 4096, %s5593_s25, [#allocation6], %s5450_s0, %s5450_s0, %s5451_s21  }
  0x69   :  { %s5452_s16 = smov [#allocation10]   ;;  %s5453_s11 = smov [#allocation13]  }
  0x6a   :  { %s76_s17 = sshll.u32 %s5452_s16, 4  ;;  %s104_s1 = sshll.u32 %s5453_s11, 4  ;;  %s77_s17 = int_to_ptr.vmem [resolvable:$true] %s76_s17  ;;  %s5624_s1 = int_to_ptr.vmem [resolvable:$true] %s104_s1 }
  0x6b   :  { %s5316_s22 = scalar_lea.hbm %s5876_s5, 4096 }
  0x6c   :  { %p5317_p6 = scmp.ne.s32.totalorder %s5876_s5, %s5316_s22  ;;  %p5320_p7 = scmp.lt.u32.totalorder %s5316_s22, %s5876_s5 }
  0x6e   :  { %p5322_p8 = pnand %p5320_p7, %p5317_p6 }
  0x70   :  { %5325 = shalt.err (!%p5322_p8)
}
  0x71   :  { %s5326_s3 = scalar_lea.vmem %s77_s17, 4096  ;;  %p5331_p10 = scmp.lt.s32.totalorder %s77_s17, %s77_s17 }
  0x72   :  { %p5327_p9 = scmp.ne.s32.totalorder %s77_s17, %s5326_s3  ;;  %p5332_p11 = scmp.lt.s32.totalorder %s5326_s3, %s5326_s3 }
  0x74   :  { %p5333_p12 = por %p5332_p11, %p5331_p10 }
  0x76   :  { %p5334_p13 = pnand %p5333_p12, %p5327_p9 }
  0x78   :  { %5337 = shalt.err (!%p5334_p13)
}
  0x79   :  { %82 = dma.hbm_to_vmem [thread:$0]  %s5876_s5, 4096, %s77_s17, [#allocation9], %s5450_s0, %s5450_s0, %s5451_s21  }
  0x7a   :  { %s5338_s30 = scalar_lea.hbm %s5880_s9, 32768 }
  0x7b   :  { %p5339_p0 = scmp.ne.s32.totalorder %s5880_s9, %s5338_s30  ;;  %p5342_p1 = scmp.lt.u32.totalorder %s5338_s30, %s5880_s9 }
  0x7d   :  { %p5344_p2 = pnand %p5342_p1, %p5339_p0 }
  0x7f   :  { %5347 = shalt.err (!%p5344_p2)
}
  0x80   :  { %s5348_s22 = scalar_lea.vmem %s5624_s1, 32768  ;;  %p5353_p4 = scmp.lt.s32.totalorder %s5624_s1, %s5624_s1 }
  0x81   :  { %p5349_p3 = scmp.ne.s32.totalorder %s5624_s1, %s5348_s22  ;;  %p5354_p5 = scmp.lt.s32.totalorder %s5348_s22, %s5348_s22 }
  0x83   :  { %p5355_p6 = por %p5354_p5, %p5353_p4 }
  0x85   :  { %p5356_p7 = pnand %p5355_p6, %p5349_p3 }
  0x87   :  { %5359 = shalt.err (!%p5356_p7)
}
  0x88   :  { %s5454_s5 = smov 512   ;;  %s5455_s0 = smov 32  }
  0x89   :  { %110 = dma.hbm_to_vmem [thread:$0]  %s5880_s9, 32768, %s5624_s1, [#allocation12], %s5454_s5, %s5454_s5, %s5455_s0  }
  0x8a   :  { %s5456_s23 = smov [#allocation16]   ;;  %s5457_s24 = smov [#allocation17]  }
  0x8b   :  { %s132_s4 = sshll.u32 %s5456_s23, 4  ;;  %s144_s26 = sshll.u32 %s5457_s24, 4  ;;  %s133_s4 = int_to_ptr.vmem [resolvable:$true] %s132_s4  ;;  %s5655_s26 = int_to_ptr.vmem [resolvable:$true] %s144_s26 }
  0x8c   :  { %s5360_s19 = scalar_lea.hbm %s5884_s13, 1024 }
  0x8d   :  { %p5361_p8 = scmp.ne.s32.totalorder %s5884_s13, %s5360_s19  ;;  %p5364_p9 = scmp.lt.u32.totalorder %s5360_s19, %s5884_s13 }
  0x8f   :  { %p5366_p10 = pnand %p5364_p9, %p5361_p8 }
  0x91   :  { %5369 = shalt.err (!%p5366_p10)
}
  0x92   :  { %s5370_s9 = scalar_lea.vmem %s133_s4, 1024  ;;  %p5375_p12 = scmp.lt.s32.totalorder %s133_s4, %s133_s4 }
  0x93   :  { %p5371_p11 = scmp.ne.s32.totalorder %s133_s4, %s5370_s9  ;;  %p5376_p13 = scmp.lt.s32.totalorder %s5370_s9, %s5370_s9 }
  0x95   :  { %p5377_p0 = por %p5376_p13, %p5375_p12 }
  0x97   :  { %p5378_p1 = pnand %p5377_p0, %p5371_p11 }
  0x99   :  { %5381 = shalt.err (!%p5378_p1)
}
  0x9a   :  { %138 = dma.hbm_to_vmem [thread:$0]  %s5884_s13, 1024, %s133_s4, [#allocation15], %s5446_s7, %s5446_s7, %s5447_s28  }
  0x9b   :  { %s5382_s22 = scalar_lea.hbm %s5885_s14, 1024 }
  0x9c   :  { %p5383_p2 = scmp.ne.s32.totalorder %s5885_s14, %s5382_s22  ;;  %p5386_p3 = scmp.lt.u32.totalorder %s5382_s22, %s5885_s14 }
  0x9e   :  { %p5388_p4 = pnand %p5386_p3, %p5383_p2 }
  0xa0   :  { %5391 = shalt.err (!%p5388_p4)
}
  0xa1   :  { %s5392_s23 = scalar_lea.vmem %s5655_s26, 1024  ;;  %p5397_p6 = scmp.lt.s32.totalorder %s5655_s26, %s5655_s26 }
  0xa2   :  { %p5393_p5 = scmp.ne.s32.totalorder %s5655_s26, %s5392_s23  ;;  %p5398_p7 = scmp.lt.s32.totalorder %s5392_s23, %s5392_s23 }
  0xa4   :  { %p5399_p8 = por %p5398_p7, %p5397_p6 }
  0xa6   :  { %p5400_p9 = pnand %p5399_p8, %p5393_p5 }
  0xa8   :  { %5403 = shalt.err (!%p5400_p9)
}
  0xa9   :  { %150 = dma.hbm_to_vmem [thread:$0]  %s5885_s14, 1024, %s5655_s26, [#allocation18], %s5446_s7, %s5446_s7, %s5447_s28  }
  0xaa   :  { %5426 = dma.done.wait [#allocation3], 128  }
  0xab   :  { %5427 = vsyncadd [#allocation3], 4294967168 }
  0xac   :  { %5428 = dma.done.wait [#allocation6], 4224  }
  0xad   :  { %5429 = vsyncadd [#allocation6], 4294963072 }
  0xae   :  { %5430 = dma.done.wait [#allocation9], 4128  }
  0xaf   :  { %5431 = vsyncadd [#allocation9], 4294963168 }
  0xb0   :  { %5432 = dma.done.wait [#allocation12], 40960  }
  0xb1   :  { %5433 = vsyncadd [#allocation12], 4294926336 }
  0xb2   :  { %5434 = dma.done.wait [#allocation15], 9216  }
  0xb3   :  { %5435 = vsyncadd [#allocation15], 4294958080 }
  0xb4   :  { %5436 = dma.done.wait [#allocation18], 1024  }
  0xb5   :  { %5437 = vsyncadd [#allocation18], 4294966272  ;;  %v5458_v0 = vmov 0   ;;  %v184_v1 = vld [vmem:[#allocation5] sm:$0xff]  ;;  %vm206_vm0 = vcmask 1043456   ;;  %v182_v2 = vld [vmem:[#allocation2] sm:$0xff] }
  0xb6   :  { %245 = vmatprep.mubr.bf16.mxu0 %v5458_v0  ;;  %v4187_v3 = vcombine.high %v184_v1, %v184_v1  ;;  %v4186_v4 = vcombine.low %v184_v1, %v184_v1  ;;  %v4908_v5 = vld [vmem:[#allocation7 + $0x4] ss:$8 sps:$4 sm:$0xff]   ;;  %v4910_v6 = vld [vmem:[#allocation7] ss:$8 sps:$4 sm:$0xff]   ;;  %v4911_v7 = vld [vmem:[#allocation7 + $0x14] ss:$8 sps:$4 sm:$0xff]   ;;  %v183_v9 = vpack.c.bf16 %v182_v2, %v182_v2 }
  0xb7   :  { %462 = vmatprep.subr.bf16.mxu1 %v4908_v5  ;;  %vm202_vm1 = vcmask 64512   ;;  %v4913_v10 = vld [vmem:[#allocation7 + $0x10] ss:$8 sps:$4 sm:$0xff]   ;;  %v4914_v11 = vld [vmem:[#allocation7 + $0x24] ss:$8 sps:$4 sm:$0xff]   ;;  %vm5460_vm2 = vmmov 0  }
  0xb8   :  { %4188 = vmatprep.subr.msk.bf16.mxu0 %vm206_vm0, %v4187_v3  ;;  %v208_v8 = vsel %vm206_vm0, %v4186_v4, 0  ;;  %463 = vmatpush1.bf16.msra.mxu1 %v4910_v6  ;;  %v4916_v12 = vld [vmem:[#allocation7 + $0x20] ss:$8 sps:$4 sm:$0xff]   ;;  %v4917_v13 = vld [vmem:[#allocation7 + $0x34] ss:$8 sps:$4 sm:$0xff]   ;;  %v187_v3 = vlaneseq }
  0xb9   :  { %214 = vmatpush1.bf16.msra.mxu0 %v208_v8  ;;  %464 = vmatprep.subr.bf16.mxu1 %v4911_v7  ;;  %v4919_v14 = vld [vmem:[#allocation7 + $0x30] ss:$8 sps:$4 sm:$0xff]   ;;  %v4920_v15 = vld [vmem:[#allocation7 + $0x44] ss:$8 sps:$4 sm:$0xff]   ;;  %v4922_v16 = vld [vmem:[#allocation7 + $0x40] ss:$8 sps:$4 sm:$0xff]  }
  0xba   :  { %v4923_v17 = vld [vmem:[#allocation7 + $0x54] ss:$8 sps:$4 sm:$0xff]   ;;  %v4925_v18 = vld [vmem:[#allocation7 + $0x50] ss:$8 sps:$4 sm:$0xff]   ;;  %v4926_v19 = vld [vmem:[#allocation7 + $0x64] ss:$8 sps:$4 sm:$0xff]  }
  0xbb   :  { %v4928_v20 = vld [vmem:[#allocation7 + $0x60] ss:$8 sps:$4 sm:$0xff]   ;;  %v4929_v21 = vld [vmem:[#allocation7 + $0x74] ss:$8 sps:$4 sm:$0xff]   ;;  %v4931_v22 = vld [vmem:[#allocation7 + $0x70] ss:$8 sps:$4 sm:$0xff]  }
  0xbc   :  { %4189 = vmatmul.mubr.msk.bf16.vlgmr.msra.gmra.mrb[0].mxu0 %vm202_vm1, %v183_v9  ;;  %465 = vmatpush1.bf16.msra.mxu1 %v4913_v10  ;;  %v4932_v23 = vld [vmem:[#allocation7 + $0x84] ss:$8 sps:$4 sm:$0xff]   ;;  %v4934_v24 = vld [vmem:[#allocation7 + $0x80] ss:$8 sps:$4 sm:$0xff]   ;;  %v4935_v25 = vld [vmem:[#allocation7 + $0x94] ss:$8 sps:$4 sm:$0xff]  }
  0xbd   :  { %466 = vmatprep.subr.bf16.mxu1 %v4914_v11  ;;  %v4937_v26 = vld [vmem:[#allocation7 + $0x90] ss:$8 sps:$4 sm:$0xff]   ;;  %v4938_v27 = vld [vmem:[#allocation7 + $0xa4] ss:$8 sps:$4 sm:$0xff]   ;;  %v4940_v28 = vld [vmem:[#allocation7 + $0xa0] ss:$8 sps:$4 sm:$0xff]  }
  0xbe   :  { %v4941_v29 = vld [vmem:[#allocation7 + $0xb4] ss:$8 sps:$4 sm:$0xff]   ;;  %v4943_v30 = vld [vmem:[#allocation7 + $0xb0] ss:$8 sps:$4 sm:$0xff]   ;;  %v4944_v31 = vld [vmem:[#allocation7 + $0xc4] ss:$8 sps:$4 sm:$0xff]  }
  0xbf   :  { %v4946_v32 = vld [vmem:[#allocation7 + $0xc0] ss:$8 sps:$4 sm:$0xff]   ;;  %v4947_v33 = vld [vmem:[#allocation7 + $0xd4] ss:$8 sps:$4 sm:$0xff]   ;;  %v4949_v34 = vld [vmem:[#allocation7 + $0xd0] ss:$8 sps:$4 sm:$0xff]  }
  0xc0   :  { %467 = vmatpush1.bf16.msra.mxu1 %v4916_v12  ;;  %v4950_v35 = vld [vmem:[#allocation7 + $0xe4] ss:$8 sps:$4 sm:$0xff]   ;;  %v4952_v36 = vld [vmem:[#allocation7 + $0xe0] ss:$8 sps:$4 sm:$0xff]   ;;  %v4953_v37 = vld [vmem:[#allocation7 + $0xf4] ss:$8 sps:$4 sm:$0xff]  }
  0xc1   :  { %468 = vmatprep.subr.bf16.mxu1 %v4917_v13  ;;  %v4955_v38 = vld [vmem:[#allocation7 + $0xf0] ss:$8 sps:$4 sm:$0xff]   ;;  %v4956_v39 = vld [vmem:[#allocation10] ss:$8 sps:$4 sm:$0xff]   ;;  %v5693_v4 = vshrl.u32 %v187_v3, 7 }
  0xc2   :  { %v4958_v40 = vld [vmem:[#allocation10 + $0x4] ss:$8 sps:$4 sm:$0xff]   ;;  %v4961_v41 = vld [vmem:[#allocation10 + $0x14] ss:$8 sps:$4 sm:$0xff]   ;;  %v4959_v42 = vld [vmem:[#allocation10 + $0x10] ss:$8 sps:$4 sm:$0xff]  }
  0xc3   :  { %711 = vmatprep.subr.bf16.mxu0 %v4958_v40  ;;  %v4964_v43 = vld [vmem:[#allocation10 + $0x24] ss:$8 sps:$4 sm:$0xff]   ;;  %v4962_v44 = vld [vmem:[#allocation10 + $0x20] ss:$8 sps:$4 sm:$0xff]   ;;  %v4967_v45 = vld [vmem:[#allocation10 + $0x34] ss:$8 sps:$4 sm:$0xff]  }
  0xc4   :  { %469 = vmatpush1.bf16.msra.mxu1 %v4919_v14  ;;  %712 = vmatpush1.bf16.msra.mxu0 %v4956_v39  ;;  %v4965_v46 = vld [vmem:[#allocation10 + $0x30] ss:$8 sps:$4 sm:$0xff]   ;;  %v4970_v47 = vld [vmem:[#allocation10 + $0x44] ss:$8 sps:$4 sm:$0xff]   ;;  %v4968_v48 = vld [vmem:[#allocation10 + $0x40] ss:$8 sps:$4 sm:$0xff]  }
  0xc5   :  { %470 = vmatprep.subr.bf16.mxu1 %v4920_v15  ;;  %713 = vmatprep.subr.bf16.mxu0 %v4961_v41  ;;  %v4973_v49 = vld [vmem:[#allocation10 + $0x54] ss:$8 sps:$4 sm:$0xff]   ;;  %v4971_v50 = vld [vmem:[#allocation10 + $0x50] ss:$8 sps:$4 sm:$0xff]   ;;  %v4976_v51 = vld [vmem:[#allocation10 + $0x64] ss:$8 sps:$4 sm:$0xff]  }
  0xc6   :  { %v4974_v52 = vld [vmem:[#allocation10 + $0x60] ss:$8 sps:$4 sm:$0xff]   ;;  %v4979_v53 = vld [vmem:[#allocation10 + $0x74] ss:$8 sps:$4 sm:$0xff]   ;;  %v4977_v54 = vld [vmem:[#allocation10 + $0x70] ss:$8 sps:$4 sm:$0xff]  }
  0xc7   :  { %v4982_v55 = vld [vmem:[#allocation10 + $0x84] ss:$8 sps:$4 sm:$0xff]   ;;  %v4980_v56 = vld [vmem:[#allocation10 + $0x80] ss:$8 sps:$4 sm:$0xff]   ;;  %v4985_v57 = vld [vmem:[#allocation10 + $0x94] ss:$8 sps:$4 sm:$0xff]  }
  0xc8   :  { %471 = vmatpush1.bf16.msra.mxu1 %v4922_v16  ;;  %714 = vmatpush1.bf16.msra.mxu0 %v4959_v42  ;;  %v4983_v58 = vld [vmem:[#allocation10 + $0x90] ss:$8 sps:$4 sm:$0xff]   ;;  %v4988_v59 = vld [vmem:[#allocation10 + $0xa4] ss:$8 sps:$4 sm:$0xff]   ;;  %v4986_v60 = vld [vmem:[#allocation10 + $0xa0] ss:$8 sps:$4 sm:$0xff]  }
  0xc9   :  { %472 = vmatprep.subr.bf16.mxu1 %v4923_v17  ;;  %715 = vmatprep.subr.bf16.mxu0 %v4964_v43  ;;  %v4991_v61 = vld [vmem:[#allocation10 + $0xb4] ss:$8 sps:$4 sm:$0xff]   ;;  %v4989_v62 = vld [vmem:[#allocation10 + $0xb0] ss:$8 sps:$4 sm:$0xff]   ;;  %v4994_v63 = vld [vmem:[#allocation10 + $0xc4] ss:$8 sps:$4 sm:$0xff]  }
  0xca   :  { %v4992_v0 = vld [vmem:[#allocation10 + $0xc0] ss:$8 sps:$4 sm:$0xff]   ;;  %v4997_v1 = vld [vmem:[#allocation10 + $0xd4] ss:$8 sps:$4 sm:$0xff]   ;;  %v4995_v2 = vld [vmem:[#allocation10 + $0xd0] ss:$8 sps:$4 sm:$0xff]  }
  0xcb   :  { %v5696_v5 = vsub.s32 0, %v5693_v4  ;;  %v185_v6 = vld [vmem:[%s5873_s2] sm:$0x3]  ;;  %v5702_v7 = vsub.s32 1, %v5693_v4  ;;  %v5048_v39 = vld [vmem:[#allocation11 + $0xe4] ss:$16 sps:$4 sm:$0xff]  }
  0xcc   :  { %473 = vmatpush1.bf16.msra.mxu1 %v4925_v18  ;;  %716 = vmatpush1.bf16.msra.mxu0 %v4962_v44  ;;  %v5046_v40 = vld [vmem:[#allocation11 + $0xe0] ss:$16 sps:$4 sm:$0xff]   ;;  %v5054_v41 = vld [vmem:[#allocation11 + $0x104] ss:$16 sps:$4 sm:$0xff]  }
  0xcd   :  { %474 = vmatprep.subr.bf16.mxu1 %v4926_v19  ;;  %717 = vmatprep.subr.bf16.mxu0 %v4967_v45  ;;  %v190_v8 = vrot.slane %v185_v6, %v5696_v5  ;;  %v194_v9 = vrot.slane %v185_v6, %v5702_v7  ;;  %v5052_v42 = vld [vmem:[#allocation11 + $0x100] ss:$16 sps:$4 sm:$0xff]   ;;  %v5060_v43 = vld [vmem:[#allocation11 + $0x124] ss:$16 sps:$4 sm:$0xff]   ;;  %v5015_v6 = vld [vmem:[#allocation11 + $0x2c] ss:$16 sps:$4 sm:$0xff]  }
  0xce   :  { %v5058_v44 = vld [vmem:[#allocation11 + $0x120] ss:$16 sps:$4 sm:$0xff]   ;;  %v5066_v45 = vld [vmem:[#allocation11 + $0x144] ss:$16 sps:$4 sm:$0xff]  }
  0xd0   :  { %475 = vmatpush1.bf16.msra.mxu1 %v4928_v20  ;;  %718 = vmatpush1.bf16.msra.mxu0 %v4965_v46  ;;  %v5000_v20 = vld [vmem:[#allocation10 + $0xe4] ss:$8 sps:$4 sm:$0xff]   ;;  %v5064_v46 = vld [vmem:[#allocation11 + $0x140] ss:$16 sps:$4 sm:$0xff]  }
  0xd1   :  { %476 = vmatprep.subr.bf16.mxu1 %v4929_v21  ;;  %719 = vmatprep.subr.bf16.mxu0 %v4970_v47  ;;  %v4998_v21 = vld [vmem:[#allocation10 + $0xe0] ss:$8 sps:$4 sm:$0xff]   ;;  %v5072_v47 = vld [vmem:[#allocation11 + $0x164] ss:$16 sps:$4 sm:$0xff]  }
  0xd4   :  { %477 = vmatpush1.bf16.msra.mxu1 %v4931_v22  ;;  %720 = vmatpush1.bf16.msra.mxu0 %v4968_v48  ;;  %v5003_v22 = vld [vmem:[#allocation10 + $0xf4] ss:$8 sps:$4 sm:$0xff]   ;;  %v5070_v48 = vld [vmem:[#allocation11 + $0x160] ss:$16 sps:$4 sm:$0xff]  }
  0xd5   :  { %478 = vmatprep.subr.bf16.mxu1 %v4932_v23  ;;  %721 = vmatprep.subr.bf16.mxu0 %v4973_v49  ;;  %v5001_v23 = vld [vmem:[#allocation10 + $0xf0] ss:$8 sps:$4 sm:$0xff]   ;;  %v5078_v49 = vld [vmem:[#allocation11 + $0x184] ss:$16 sps:$4 sm:$0xff]  }
  0xd8   :  { %479 = vmatpush1.bf16.msra.mxu1 %v4934_v24  ;;  %722 = vmatpush1.bf16.msra.mxu0 %v4971_v50  ;;  %v5004_v24 = vld [vmem:[#allocation11] ss:$16 sps:$4 sm:$0xff]  }
  0xd9   :  { %480 = vmatprep.subr.bf16.mxu1 %v4935_v25  ;;  %723 = vmatprep.subr.bf16.mxu0 %v4976_v51  ;;  %v5006_v25 = vld [vmem:[#allocation11 + $0x4] ss:$16 sps:$4 sm:$0xff]   ;;  %v5076_v50 = vld [vmem:[#allocation11 + $0x180] ss:$16 sps:$4 sm:$0xff]  }
  0xda   :  { %v5084_v51 = vld [vmem:[#allocation11 + $0x1a4] ss:$16 sps:$4 sm:$0xff]  }
  0xdc   :  { %481 = vmatpush1.bf16.msra.mxu1 %v4937_v26  ;;  %724 = vmatpush1.bf16.msra.mxu0 %v4974_v52  ;;  %v5009_v26 = vld [vmem:[#allocation11 + $0xc] ss:$16 sps:$4 sm:$0xff]   ;;  %v5082_v52 = vld [vmem:[#allocation11 + $0x1a0] ss:$16 sps:$4 sm:$0xff]  }
  0xdd   :  { %482 = vmatprep.subr.bf16.mxu1 %v4938_v27  ;;  %725 = vmatprep.subr.bf16.mxu0 %v4979_v53  ;;  %v5012_v27 = vld [vmem:[#allocation11 + $0x24] ss:$16 sps:$4 sm:$0xff]   ;;  %v290_v53 = vld [vmem:[#allocation8] sm:$0x3] }
  0xe0   :  { %483 = vmatpush1.bf16.msra.mxu1 %v4940_v28  ;;  %726 = vmatpush1.bf16.msra.mxu0 %v4977_v54  ;;  %v5010_v28 = vld [vmem:[#allocation11 + $0x20] ss:$16 sps:$4 sm:$0xff]   ;;  %v295_v54 = vrot.slane %v290_v53, %v5696_v5 }
  0xe1   :  { %484 = vmatprep.subr.bf16.mxu1 %v4941_v29  ;;  %727 = vmatprep.subr.bf16.mxu0 %v4982_v55  ;;  %v5018_v29 = vld [vmem:[#allocation11 + $0x44] ss:$16 sps:$4 sm:$0xff]   ;;  %v299_v55 = vrot.slane %v290_v53, %v5702_v7 }
  0xe4   :  { %485 = vmatpush1.bf16.msra.mxu1 %v4943_v30  ;;  %728 = vmatpush1.bf16.msra.mxu0 %v4980_v56  ;;  %v5016_v30 = vld [vmem:[#allocation11 + $0x40] ss:$16 sps:$4 sm:$0xff]  }
  0xe5   :  { %486 = vmatprep.subr.bf16.mxu1 %v4944_v31  ;;  %729 = vmatprep.subr.bf16.mxu0 %v4985_v57  ;;  %v5024_v31 = vld [vmem:[#allocation11 + $0x64] ss:$16 sps:$4 sm:$0xff]  }
  0xe8   :  { %487 = vmatpush1.bf16.msra.mxu1 %v4946_v32  ;;  %730 = vmatpush1.bf16.msra.mxu0 %v4983_v58  ;;  %v5022_v32 = vld [vmem:[#allocation11 + $0x60] ss:$16 sps:$4 sm:$0xff]  }
  0xe9   :  { %488 = vmatprep.subr.bf16.mxu1 %v4947_v33  ;;  %731 = vmatprep.subr.bf16.mxu0 %v4988_v59  ;;  %v5030_v33 = vld [vmem:[#allocation11 + $0x84] ss:$16 sps:$4 sm:$0xff]  }
  0xec   :  { %489 = vmatpush1.bf16.msra.mxu1 %v4949_v34  ;;  %732 = vmatpush1.bf16.msra.mxu0 %v4986_v60  ;;  %v5028_v34 = vld [vmem:[#allocation11 + $0x80] ss:$16 sps:$4 sm:$0xff]  }
  0xed   :  { %490 = vmatprep.subr.bf16.mxu1 %v4950_v35  ;;  %733 = vmatprep.subr.bf16.mxu0 %v4991_v61  ;;  %v5036_v35 = vld [vmem:[#allocation11 + $0xa4] ss:$16 sps:$4 sm:$0xff]  }
  0xf0   :  { %491 = vmatpush1.bf16.msra.mxu1 %v4952_v36  ;;  %734 = vmatpush1.bf16.msra.mxu0 %v4989_v62  ;;  %v5034_v36 = vld [vmem:[#allocation11 + $0xa0] ss:$16 sps:$4 sm:$0xff]  }
  0xf1   :  { %492 = vmatprep.subr.bf16.mxu1 %v4953_v37  ;;  %735 = vmatprep.subr.bf16.mxu0 %v4994_v63  ;;  %v5042_v37 = vld [vmem:[#allocation11 + $0xc4] ss:$16 sps:$4 sm:$0xff]  }
  0xf4   :  { %493 = vmatpush1.bf16.msra.mxu1 %v4955_v38  ;;  %736 = vmatpush1.bf16.msra.mxu0 %v4992_v0  ;;  %v5040_v38 = vld [vmem:[#allocation11 + $0xc0] ss:$16 sps:$4 sm:$0xff]  }
  0xf5   :  { %737 = vmatprep.subr.bf16.mxu0 %v4997_v1  ;;  %1164 = vmatprep.subr.bf16.mxu1 %v5006_v25  ;;  %v5007_v1 = vld [vmem:[#allocation11 + $0x8] ss:$16 sps:$4 sm:$0xff]   ;;  %v5063_v25 = vld [vmem:[#allocation11 + $0x12c] ss:$16 sps:$4 sm:$0xff]  }
  0xf8   :  { %738 = vmatpush1.bf16.msra.mxu0 %v4995_v2 }
  0xf9   :  { %739 = vmatprep.subr.bf16.mxu0 %v5000_v20  ;;  %v5043_v20 = vld [vmem:[#allocation11 + $0xc8] ss:$16 sps:$4 sm:$0xff]  }
  0xfc   :  { %740 = vmatpush1.bf16.msra.mxu0 %v4998_v21  ;;  %v5051_v21 = vld [vmem:[#allocation11 + $0xec] ss:$16 sps:$4 sm:$0xff]  }
  0xfd   :  { %741 = vmatprep.subr.bf16.mxu0 %v5003_v22  ;;  %v5049_v22 = vld [vmem:[#allocation11 + $0xe8] ss:$16 sps:$4 sm:$0xff]  }
 0x100   :  { %742 = vmatpush1.bf16.msra.mxu0 %v5001_v23  ;;  %v5057_v23 = vld [vmem:[#allocation11 + $0x10c] ss:$16 sps:$4 sm:$0xff]  }
 0x101   :  { %1205 = vmatprep.subr.bf16.mxu0 %v5009_v26  ;;  %v5061_v26 = vld [vmem:[#allocation11 + $0x128] ss:$16 sps:$4 sm:$0xff]  }
 0x18f   :  { %v247_v10 = vpop.f32.mrb[0].mxu0 }
 0x190   :  { %v248_v11 = vadd.f32 %v247_v10, %v190_v8  ;;  %v249_v12 = vpop.f32.mrb[1].mxu0  ;;  %v5013_v8 = vld [vmem:[#allocation11 + $0x28] ss:$16 sps:$4 sm:$0xff]  }
 0x191   :  { %v250_v13 = vadd.f32 %v249_v12, %v194_v9  ;;  %v251_v14 = vpop.f32.mrb[2].mxu0  ;;  %v5021_v9 = vld [vmem:[#allocation11 + $0x4c] ss:$16 sps:$4 sm:$0xff]   ;;  %v5019_v10 = vld [vmem:[#allocation11 + $0x48] ss:$16 sps:$4 sm:$0xff]  }
 0x192   :  { %v5706_v15 = vmax.f32 %v248_v11, 0.0  ;;  %v252_v16 = vpop.f32.mrb[3].mxu0  ;;  %v5027_v11 = vld [vmem:[#allocation11 + $0x6c] ss:$16 sps:$4 sm:$0xff]   ;;  %v5025_v12 = vld [vmem:[#allocation11 + $0x68] ss:$16 sps:$4 sm:$0xff]  }
 0x193   :  { %v5708_v17 = vmax.f32 %v250_v13, 0.0  ;;  %v5033_v13 = vld [vmem:[#allocation11 + $0x8c] ss:$16 sps:$4 sm:$0xff]   ;;  %v5031_v14 = vld [vmem:[#allocation11 + $0x88] ss:$16 sps:$4 sm:$0xff]  }
 0x194   :  { %v256_v19 = vpack.c.bf16 %v5706_v15, %v5706_v15  ;;  %v5039_v16 = vld [vmem:[#allocation11 + $0xac] ss:$16 sps:$4 sm:$0xff]  }
 0x195   :  { %v257_v18 = vpack.c.bf16 %v5708_v17, %v5708_v17 }
 0x197   :  { %494 = vmatprep.mubr.bf16.mxu1 %v257_v18  ;;  %v5037_v18 = vld [vmem:[#allocation11 + $0xa8] ss:$16 sps:$4 sm:$0xff]  }
 0x198   :  { %495 = vmatmul.mubr.bf16.vlgmr.msra.gmra.mrb[0].mxu1 %v256_v19  ;;  %v5045_v19 = vld [vmem:[#allocation11 + $0xcc] ss:$16 sps:$4 sm:$0xff]  }
 0x199   :  { %1165 = vmatpush1.bf16.msra.mxu1 %v5004_v24  ;;  %v5055_v24 = vld [vmem:[#allocation11 + $0x108] ss:$16 sps:$4 sm:$0xff]  }
 0x19a   :  { %1166 = vmatprep.subr.bf16.mxu1 %v5012_v27  ;;  %v5069_v27 = vld [vmem:[#allocation11 + $0x14c] ss:$16 sps:$4 sm:$0xff]  }
 0x19d   :  { %1167 = vmatpush1.bf16.msra.mxu1 %v5010_v28  ;;  %v5067_v28 = vld [vmem:[#allocation11 + $0x148] ss:$16 sps:$4 sm:$0xff]  }
 0x19e   :  { %1168 = vmatprep.subr.bf16.mxu1 %v5018_v29  ;;  %v5075_v29 = vld [vmem:[#allocation11 + $0x16c] ss:$16 sps:$4 sm:$0xff]  }
 0x1a1   :  { %1169 = vmatpush1.bf16.msra.mxu1 %v5016_v30  ;;  %v5073_v30 = vld [vmem:[#allocation11 + $0x168] ss:$16 sps:$4 sm:$0xff]  }
 0x1a2   :  { %1170 = vmatprep.subr.bf16.mxu1 %v5024_v31  ;;  %v5081_v31 = vld [vmem:[#allocation11 + $0x18c] ss:$16 sps:$4 sm:$0xff]  }
 0x1a5   :  { %1171 = vmatpush1.bf16.msra.mxu1 %v5022_v32  ;;  %v5079_v32 = vld [vmem:[#allocation11 + $0x188] ss:$16 sps:$4 sm:$0xff]  }
 0x1a6   :  { %1172 = vmatprep.subr.bf16.mxu1 %v5030_v33  ;;  %v5087_v33 = vld [vmem:[#allocation11 + $0x1ac] ss:$16 sps:$4 sm:$0xff]  }
 0x1a9   :  { %1173 = vmatpush1.bf16.msra.mxu1 %v5028_v34  ;;  %v5085_v34 = vld [vmem:[#allocation11 + $0x1a8] ss:$16 sps:$4 sm:$0xff]  }
 0x1aa   :  { %1174 = vmatprep.subr.bf16.mxu1 %v5036_v35  ;;  %v5090_v35 = vld [vmem:[#allocation11 + $0x1c4] ss:$16 sps:$4 sm:$0xff]  }
 0x1ad   :  { %1175 = vmatpush1.bf16.msra.mxu1 %v5034_v36  ;;  %v5093_v36 = vld [vmem:[#allocation11 + $0x1cc] ss:$16 sps:$4 sm:$0xff]  }
 0x1ae   :  { %1176 = vmatprep.subr.bf16.mxu1 %v5042_v37  ;;  %v5088_v37 = vld [vmem:[#allocation11 + $0x1c0] ss:$16 sps:$4 sm:$0xff]  }
 0x1b1   :  { %1177 = vmatpush1.bf16.msra.mxu1 %v5040_v38  ;;  %v5091_v38 = vld [vmem:[#allocation11 + $0x1c8] ss:$16 sps:$4 sm:$0xff]  }
 0x1b2   :  { %1178 = vmatprep.subr.bf16.mxu1 %v5048_v39  ;;  %v5096_v39 = vld [vmem:[#allocation11 + $0x1e4] ss:$16 sps:$4 sm:$0xff]  }
 0x1b5   :  { %1179 = vmatpush1.bf16.msra.mxu1 %v5046_v40  ;;  %v5099_v40 = vld [vmem:[#allocation11 + $0x1ec] ss:$16 sps:$4 sm:$0xff]  }
 0x1b6   :  { %1180 = vmatprep.subr.bf16.mxu1 %v5054_v41  ;;  %v5094_v41 = vld [vmem:[#allocation11 + $0x1e0] ss:$16 sps:$4 sm:$0xff]  }
 0x1b9   :  { %1181 = vmatpush1.bf16.msra.mxu1 %v5052_v42  ;;  %v5097_v42 = vld [vmem:[#allocation11 + $0x1e8] ss:$16 sps:$4 sm:$0xff]  }
 0x1ba   :  { %1182 = vmatprep.subr.bf16.mxu1 %v5060_v43  ;;  %v1254_v43 = vld [vmem:[#allocation13] sm:$0xff] }
 0x1bd   :  { %1183 = vmatpush1.bf16.msra.mxu1 %v5058_v44  ;;  %v1258_v44 = vld [vmem:[#allocation13 + $0x20] sm:$0xff] }
 0x1be   :  { %1184 = vmatprep.subr.bf16.mxu1 %v5066_v45  ;;  %v1255_v45 = vld [vmem:[#allocation13 + $0x8] sm:$0xff] }
 0x1c1   :  { %1185 = vmatpush1.bf16.msra.mxu1 %v5064_v46  ;;  %v4318_v46 = vcombine.low %v1254_v43, %v1258_v44 }
 0x1c2   :  { %1186 = vmatprep.subr.bf16.mxu1 %v5072_v47  ;;  %v4319_v47 = vcombine.high %v1254_v43, %v1258_v44  ;;  %v1302_v44 = vld [vmem:[#allocation13 + $0x180] sm:$0xff] }
 0x1c5   :  { %1187 = vmatpush1.bf16.msra.mxu1 %v5070_v48  ;;  %v1259_v48 = vld [vmem:[#allocation13 + $0x28] sm:$0xff] }
 0x1c6   :  { %1188 = vmatprep.subr.bf16.mxu1 %v5078_v49  ;;  %v4320_v49 = vcombine.low %v1255_v45, %v1259_v48 }
 0x1c9   :  { %1189 = vmatpush1.bf16.msra.mxu1 %v5076_v50  ;;  %v4321_v50 = vcombine.high %v1255_v45, %v1259_v48  ;;  %v1306_v45 = vld [vmem:[#allocation13 + $0x1a0] sm:$0xff] }
 0x1ca   :  { %1190 = vmatprep.subr.bf16.mxu1 %v5084_v51  ;;  %v539_v51 = vld [vmem:[%s5877_s6] sm:$0x3] }
 0x1cb   :  { %v548_v53 = vrot.slane %v539_v51, %v5702_v7 }
 0x1cd   :  { %1191 = vmatpush1.bf16.msra.mxu1 %v5082_v52  ;;  %v544_v52 = vrot.slane %v539_v51, %v5696_v5 }
 0x1ce   :  { %1192 = vmatprep.subr.bf16.mxu1 %v5090_v35 }
 0x1d1   :  { %1193 = vmatpush1.bf16.msra.mxu1 %v5088_v37  ;;  %v1298_v37 = vld [vmem:[#allocation13 + $0x160] sm:$0xff] }
 0x1d2   :  { %1194 = vmatprep.subr.bf16.mxu1 %v5096_v39  ;;  %v1299_v39 = vld [vmem:[#allocation13 + $0x168] sm:$0xff] }
 0x1d5   :  { %1195 = vmatpush1.bf16.msra.mxu1 %v5094_v41 }
 0x1d6   :  { %2832 = vmatprep.subr.bf16.mxu1 %v4319_v47  ;;  %v1307_v47 = vld [vmem:[#allocation13 + $0x1a8] sm:$0xff] }
 0x26b   :  { %v496_v56 = vpop.f32.mrb[0].mxu1 }
 0x26c   :  { %v497_v57 = vadd.f32 %v496_v56, %v295_v54  ;;  %v498_v58 = vpop.f32.mrb[1].mxu1 }
 0x26d   :  { %v499_v59 = vadd.f32 %v498_v58, %v299_v55  ;;  %v500_v60 = vpop.f32.mrb[2].mxu1 }
 0x26e   :  { %v503_v61 = vmax.f32 %v497_v57, 0.0  ;;  %v501_v62 = vpop.f32.mrb[3].mxu1 }
 0x26f   :  { %v504_v63 = vmax.f32 %v499_v59, 0.0 }
 0x270   :  { %v505_v2 = vpack.c.bf16 %v503_v61, %v503_v61 }
 0x271   :  { %v506_v0 = vpack.c.bf16 %v504_v63, %v504_v63  ;;  %v1262_v63 = vld [vmem:[#allocation13 + $0x40] sm:$0xff] }
 0x273   :  { %743 = vmatprep.mubr.bf16.mxu0 %v506_v0 }
 0x274   :  { %744 = vmatmul.mubr.bf16.vlgmr.msra.gmra.mrb[4].mxu0 %v505_v2  ;;  %v1263_v2 = vld [vmem:[#allocation13 + $0x48] sm:$0xff] }
 0x275   :  { %1206 = vmatpush1.bf16.msra.mxu0 %v5007_v1  ;;  %v1266_v1 = vld [vmem:[#allocation13 + $0x60] sm:$0xff] }
 0x276   :  { %1207 = vmatprep.subr.bf16.mxu0 %v5015_v6  ;;  %v1267_v6 = vld [vmem:[#allocation13 + $0x68] sm:$0xff] }
 0x279   :  { %1208 = vmatpush1.bf16.msra.mxu0 %v5013_v8 }
 0x27a   :  { %1209 = vmatprep.subr.bf16.mxu0 %v5021_v9 }
 0x27d   :  { %1210 = vmatpush1.bf16.msra.mxu0 %v5019_v10  ;;  %v4327_v10 = vcombine.high %v1262_v63, %v1266_v1 }
 0x27e   :  { %1211 = vmatprep.subr.bf16.mxu0 %v5027_v11  ;;  %v4329_v11 = vcombine.high %v1263_v2, %v1267_v6 }
 0x281   :  { %1212 = vmatpush1.bf16.msra.mxu0 %v5025_v12  ;;  %v1270_v12 = vld [vmem:[#allocation13 + $0x80] sm:$0xff] }
 0x282   :  { %1213 = vmatprep.subr.bf16.mxu0 %v5033_v13  ;;  %v1274_v13 = vld [vmem:[#allocation13 + $0xa0] sm:$0xff] }
 0x285   :  { %1214 = vmatpush1.bf16.msra.mxu0 %v5031_v14  ;;  %v1271_v14 = vld [vmem:[#allocation13 + $0x88] sm:$0xff] }
 0x286   :  { %1215 = vmatprep.subr.bf16.mxu0 %v5039_v16  ;;  %v1275_v16 = vld [vmem:[#allocation13 + $0xa8] sm:$0xff] }
 0x289   :  { %1216 = vmatpush1.bf16.msra.mxu0 %v5037_v18  ;;  %v4335_v18 = vcombine.high %v1270_v12, %v1274_v13 }
 0x28a   :  { %1217 = vmatprep.subr.bf16.mxu0 %v5045_v19  ;;  %v4337_v19 = vcombine.high %v1271_v14, %v1275_v16 }
 0x28d   :  { %1218 = vmatpush1.bf16.msra.mxu0 %v5043_v20  ;;  %v1278_v20 = vld [vmem:[#allocation13 + $0xc0] sm:$0xff] }
 0x28e   :  { %1219 = vmatprep.subr.bf16.mxu0 %v5051_v21  ;;  %v1282_v21 = vld [vmem:[#allocation13 + $0xe0] sm:$0xff] }
 0x291   :  { %1220 = vmatpush1.bf16.msra.mxu0 %v5049_v22  ;;  %v1279_v22 = vld [vmem:[#allocation13 + $0xc8] sm:$0xff] }
 0x292   :  { %1221 = vmatprep.subr.bf16.mxu0 %v5057_v23  ;;  %v1283_v23 = vld [vmem:[#allocation13 + $0xe8] sm:$0xff] }
 0x295   :  { %1222 = vmatpush1.bf16.msra.mxu0 %v5055_v24  ;;  %v4334_v24 = vcombine.low %v1270_v12, %v1274_v13 }
 0x296   :  { %1223 = vmatprep.subr.bf16.mxu0 %v5063_v25  ;;  %v4336_v25 = vcombine.low %v1271_v14, %v1275_v16 }
 0x299   :  { %1224 = vmatpush1.bf16.msra.mxu0 %v5061_v26  ;;  %v4343_v26 = vcombine.high %v1278_v20, %v1282_v21 }
 0x29a   :  { %1225 = vmatprep.subr.bf16.mxu0 %v5069_v27  ;;  %v4345_v27 = vcombine.high %v1279_v22, %v1283_v23 }
 0x29d   :  { %1226 = vmatpush1.bf16.msra.mxu0 %v5067_v28  ;;  %v1286_v28 = vld [vmem:[#allocation13 + $0x100] sm:$0xff] }
 0x29e   :  { %1227 = vmatprep.subr.bf16.mxu0 %v5075_v29  ;;  %v1290_v29 = vld [vmem:[#allocation13 + $0x120] sm:$0xff] }
 0x2a1   :  { %1228 = vmatpush1.bf16.msra.mxu0 %v5073_v30  ;;  %v1287_v30 = vld [vmem:[#allocation13 + $0x108] sm:$0xff] }
 0x2a2   :  { %1229 = vmatprep.subr.bf16.mxu0 %v5081_v31  ;;  %v1291_v31 = vld [vmem:[#allocation13 + $0x128] sm:$0xff] }
 0x2a3   :  { %v4353_v35 = vcombine.high %v1287_v30, %v1291_v31  ;;  %v4352_v41 = vcombine.low %v1287_v30, %v1291_v31 }
 0x2a5   :  { %1230 = vmatpush1.bf16.msra.mxu0 %v5079_v32  ;;  %v4342_v32 = vcombine.low %v1278_v20, %v1282_v21 }
 0x2a6   :  { %1231 = vmatprep.subr.bf16.mxu0 %v5087_v33  ;;  %v4344_v33 = vcombine.low %v1279_v22, %v1283_v23 }
 0x2a9   :  { %1232 = vmatpush1.bf16.msra.mxu0 %v5085_v34  ;;  %v4351_v34 = vcombine.high %v1286_v28, %v1290_v29 }
 0x2aa   :  { %1233 = vmatprep.subr.bf16.mxu0 %v5093_v36  ;;  %v1294_v36 = vld [vmem:[#allocation13 + $0x140] sm:$0xff] }
 0x2ab   :  { %v4358_v48 = vcombine.low %v1294_v36, %v1298_v37 }
 0x2ad   :  { %1234 = vmatpush1.bf16.msra.mxu0 %v5091_v38  ;;  %v1295_v38 = vld [vmem:[#allocation13 + $0x148] sm:$0xff] }
 0x2ae   :  { %1235 = vmatprep.subr.bf16.mxu0 %v5099_v40  ;;  %v4350_v40 = vcombine.low %v1286_v28, %v1290_v29  ;;  %v4361_v43 = vcombine.high %v1295_v38, %v1299_v39 }
 0x2b1   :  { %1236 = vmatpush1.bf16.msra.mxu0 %v5097_v42  ;;  %v4359_v42 = vcombine.high %v1294_v36, %v1298_v37 }
 0x2b2   :  { %2914 = vmatprep.subr.bf16.mxu0 %v4321_v50  ;;  %v4367_v50 = vcombine.high %v1302_v44, %v1306_v45 }
 0x347   :  { %v745_v54 = vpop.f32.mrb[4].mxu0 }
 0x348   :  { %v746_v55 = vadd.f32 %v745_v54, %v544_v52  ;;  %v747_v56 = vpop.f32.mrb[5].mxu0  ;;  %v1310_v52 = vld [vmem:[#allocation13 + $0x1c0] sm:$0xff]  ;;  %v1311_v54 = vld [vmem:[#allocation13 + $0x1c8] sm:$0xff] }
 0x349   :  { %v748_v57 = vadd.f32 %v747_v56, %v548_v53  ;;  %v749_v58 = vpop.f32.mrb[6].mxu0  ;;  %v1314_v53 = vld [vmem:[#allocation13 + $0x1e0] sm:$0xff]  ;;  %v4366_v56 = vcombine.low %v1302_v44, %v1306_v45 }
 0x34a   :  { %v752_v59 = vadd.f32 %v746_v55, %v5706_v15  ;;  %v750_v60 = vpop.f32.mrb[7].mxu0  ;;  %v4326_v15 = vcombine.low %v1262_v63, %v1266_v1  ;;  %v1315_v55 = vld [vmem:[#allocation13 + $0x1e8] sm:$0xff]  ;;  %v4375_v58 = vcombine.high %v1310_v52, %v1314_v53 }
 0x34b   :  { %v753_v61 = vadd.f32 %v748_v57, %v5708_v17  ;;  %v4328_v17 = vcombine.low %v1263_v2, %v1267_v6  ;;  %v1318_v60 = vld [vmem:[#allocation13 + $0x200] sm:$0xff]  ;;  %v1323_v63 = vld [vmem:[#allocation13 + $0x228] sm:$0xff]  ;;  %v4376_v1 = vcombine.low %v1311_v54, %v1315_v55 }
 0x34c   :  { %v754_v62 = vmax.f32 %v752_v59, 0.0  ;;  %v4377_v59 = vcombine.high %v1311_v54, %v1315_v55  ;;  %v1371_v54 = vld [vmem:[#allocation13 + $0x3a8] sm:$0xff] }
 0x34d   :  { %v755_v0 = vmax.f32 %v753_v61, 0.0  ;;  %v1322_v61 = vld [vmem:[#allocation13 + $0x220] sm:$0xff] }
 0x34e   :  { %v756_v9 = vpack.c.bf16 %v754_v62, %v754_v62  ;;  %v1319_v62 = vld [vmem:[#allocation13 + $0x208] sm:$0xff]  ;;  %v4383_v2 = vcombine.high %v1318_v60, %v1322_v61  ;;  %v4382_v12 = vcombine.low %v1318_v60, %v1322_v61 }
 0x34f   :  { %v757_v8 = vpack.c.bf16 %v755_v0, %v755_v0  ;;  %v4374_v0 = vcombine.low %v1310_v52, %v1314_v53  ;;  %v4385_v6 = vcombine.high %v1319_v62, %v1323_v63  ;;  %v4384_v13 = vcombine.low %v1319_v62, %v1323_v63  ;;  %v1367_v52 = vld [vmem:[#allocation13 + $0x388] sm:$0xff] }
 0x350   :  { %v1375_v60 = vld [vmem:[#allocation13 + $0x3c8] sm:$0xff] }
 0x351   :  { %1196 = vmatprep.mubr.bf16.mxu1 %v757_v8  ;;  %1237 = vmatprep.mubr.bf16.mxu0 %v757_v8  ;;  %v1326_v8 = vld [vmem:[#allocation13 + $0x240] sm:$0xff]  ;;  %v1379_v62 = vld [vmem:[#allocation13 + $0x3e8] sm:$0xff] }
 0x352   :  { %1197 = vmatmul.mubr.bf16.vlgmr.msra.gmra.mrb[4].mxu1 %v756_v9  ;;  %1238 = vmatmul.mubr.bf16.vlgmr.msra.gmra.mrb[8].mxu0 %v756_v9  ;;  %v1330_v9 = vld [vmem:[#allocation13 + $0x260] sm:$0xff] }
 0x353   :  { %2833 = vmatpush1.bf16.msra.mxu1 %v4318_v46  ;;  %2915 = vmatpush1.bf16.msra.mxu0 %v4320_v49  ;;  %v1303_v46 = vld [vmem:[#allocation13 + $0x188] sm:$0xff]  ;;  %v4360_v49 = vcombine.low %v1295_v38, %v1299_v39  ;;  %v4391_v14 = vcombine.high %v1326_v8, %v1330_v9  ;;  %v4390_v20 = vcombine.low %v1326_v8, %v1330_v9 }
 0x354   :  { %2834 = vmatprep.subr.bf16.mxu1 %v4327_v10  ;;  %2916 = vmatprep.subr.bf16.mxu0 %v4329_v11  ;;  %v4369_v51 = vcombine.high %v1303_v46, %v1307_v47  ;;  %v4368_v57 = vcombine.low %v1303_v46, %v1307_v47  ;;  %v1327_v10 = vld [vmem:[#allocation13 + $0x248] sm:$0xff] }
 0x355   :  { %v1331_v11 = vld [vmem:[#allocation13 + $0x268] sm:$0xff] }
 0x356   :  { %v4393_v16 = vcombine.high %v1327_v10, %v1331_v11  ;;  %v4392_v21 = vcombine.low %v1327_v10, %v1331_v11  ;;  %v1383_v8 = vld [vmem:[#allocation13 + $0x408] sm:$0xff] }
 0x357   :  { %2835 = vmatpush1.bf16.msra.mxu1 %v4326_v15  ;;  %2917 = vmatpush1.bf16.msra.mxu0 %v4328_v17  ;;  %v1334_v15 = vld [vmem:[#allocation13 + $0x280] sm:$0xff]  ;;  %v1387_v10 = vld [vmem:[#allocation13 + $0x428] sm:$0xff] }
 0x358   :  { %2836 = vmatprep.subr.bf16.mxu1 %v4335_v18  ;;  %2918 = vmatprep.subr.bf16.mxu0 %v4337_v19  ;;  %v1338_v17 = vld [vmem:[#allocation13 + $0x2a0] sm:$0xff]  ;;  %v1335_v18 = vld [vmem:[#allocation13 + $0x288] sm:$0xff] }
 0x359   :  { %v1339_v19 = vld [vmem:[#allocation13 + $0x2a8] sm:$0xff]  ;;  %v4399_v22 = vcombine.high %v1334_v15, %v1338_v17  ;;  %v4398_v28 = vcombine.low %v1334_v15, %v1338_v17 }
 0x35a   :  { %v4401_v23 = vcombine.high %v1335_v18, %v1339_v19  ;;  %v4400_v29 = vcombine.low %v1335_v18, %v1339_v19 }
 0x35b   :  { %2837 = vmatpush1.bf16.msra.mxu1 %v4334_v24  ;;  %2919 = vmatpush1.bf16.msra.mxu0 %v4336_v25  ;;  %v1342_v24 = vld [vmem:[#allocation13 + $0x2c0] sm:$0xff] }
 0x35c   :  { %2838 = vmatprep.subr.bf16.mxu1 %v4343_v26  ;;  %2920 = vmatprep.subr.bf16.mxu0 %v4345_v27  ;;  %v1346_v25 = vld [vmem:[#allocation13 + $0x2e0] sm:$0xff]  ;;  %v1343_v26 = vld [vmem:[#allocation13 + $0x2c8] sm:$0xff] }
 0x35d   :  { %v1347_v27 = vld [vmem:[#allocation13 + $0x2e8] sm:$0xff]  ;;  %v4407_v30 = vcombine.high %v1342_v24, %v1346_v25  ;;  %v4406_v36 = vcombine.low %v1342_v24, %v1346_v25 }
 0x35e   :  { %v4409_v31 = vcombine.high %v1343_v26, %v1347_v27  ;;  %v4408_v37 = vcombine.low %v1343_v26, %v1347_v27 }
 0x35f   :  { %2839 = vmatpush1.bf16.msra.mxu1 %v4342_v32  ;;  %2921 = vmatpush1.bf16.msra.mxu0 %v4344_v33  ;;  %v1350_v32 = vld [vmem:[#allocation13 + $0x300] sm:$0xff] }
 0x360   :  { %2840 = vmatprep.subr.bf16.mxu1 %v4351_v34  ;;  %2922 = vmatprep.subr.bf16.mxu0 %v4353_v35  ;;  %v1354_v33 = vld [vmem:[#allocation13 + $0x320] sm:$0xff]  ;;  %v1351_v34 = vld [vmem:[#allocation13 + $0x308] sm:$0xff] }
 0x361   :  { %v1355_v35 = vld [vmem:[#allocation13 + $0x328] sm:$0xff]  ;;  %v4415_v38 = vcombine.high %v1350_v32, %v1354_v33  ;;  %v4414_v44 = vcombine.low %v1350_v32, %v1354_v33  ;;  %v1390_v32 = vld [vmem:[#allocation13 + $0x440] sm:$0xff] }
 0x362   :  { %v4417_v39 = vcombine.high %v1351_v34, %v1355_v35  ;;  %v4416_v45 = vcombine.low %v1351_v34, %v1355_v35  ;;  %v1394_v34 = vld [vmem:[#allocation13 + $0x460] sm:$0xff]  ;;  %v1391_v35 = vld [vmem:[#allocation13 + $0x448] sm:$0xff] }
 0x363   :  { %2841 = vmatpush1.bf16.msra.mxu1 %v4350_v40  ;;  %2923 = vmatpush1.bf16.msra.mxu0 %v4352_v41  ;;  %v1358_v40 = vld [vmem:[#allocation13 + $0x340] sm:$0xff] }
 0x364   :  { %2842 = vmatprep.subr.bf16.mxu1 %v4359_v42  ;;  %2924 = vmatprep.subr.bf16.mxu0 %v4361_v43  ;;  %v1362_v41 = vld [vmem:[#allocation13 + $0x360] sm:$0xff]  ;;  %v1359_v42 = vld [vmem:[#allocation13 + $0x348] sm:$0xff] }
 0x365   :  { %v1363_v43 = vld [vmem:[#allocation13 + $0x368] sm:$0xff]  ;;  %v4423_v46 = vcombine.high %v1358_v40, %v1362_v41 }
 0x366   :  { %v4425_v47 = vcombine.high %v1359_v42, %v1363_v43 }
 0x367   :  { %2843 = vmatpush1.bf16.msra.mxu1 %v4358_v48  ;;  %2925 = vmatpush1.bf16.msra.mxu0 %v4360_v49  ;;  %v4422_v48 = vcombine.low %v1358_v40, %v1362_v41  ;;  %v4424_v49 = vcombine.low %v1359_v42, %v1363_v43  ;;  %v4455_v40 = vcombine.high %v1390_v32, %v1394_v34  ;;  %v1402_v42 = vld [vmem:[#allocation13 + $0x4a0] sm:$0xff]  ;;  %v1399_v43 = vld [vmem:[#allocation13 + $0x488] sm:$0xff] }
 0x368   :  { %2844 = vmatprep.subr.bf16.mxu1 %v4367_v50  ;;  %2926 = vmatprep.subr.bf16.mxu0 %v4369_v51  ;;  %v1366_v50 = vld [vmem:[#allocation13 + $0x380] sm:$0xff] }
 0x369   :  { %v1370_v51 = vld [vmem:[#allocation13 + $0x3a0] sm:$0xff] }
 0x36a   :  { %v4431_v53 = vcombine.high %v1366_v50, %v1370_v51  ;;  %v4430_v55 = vcombine.low %v1366_v50, %v1370_v51  ;;  %v1406_v50 = vld [vmem:[#allocation13 + $0x4c0] sm:$0xff] }
 0x36b   :  { %2845 = vmatpush1.bf16.msra.mxu1 %v4366_v56  ;;  %2927 = vmatpush1.bf16.msra.mxu0 %v4368_v57  ;;  %v4432_v56 = vcombine.low %v1367_v52, %v1371_v54  ;;  %v4433_v57 = vcombine.high %v1367_v52, %v1371_v54  ;;  %v1410_v51 = vld [vmem:[#allocation13 + $0x4e0] sm:$0xff]  ;;  %v1407_v52 = vld [vmem:[#allocation13 + $0x4c8] sm:$0xff] }
 0x36c   :  { %2846 = vmatprep.subr.bf16.mxu1 %v4375_v58  ;;  %2928 = vmatprep.subr.bf16.mxu0 %v4377_v59  ;;  %v1374_v58 = vld [vmem:[#allocation13 + $0x3c0] sm:$0xff] }
 0x36d   :  { %v1378_v59 = vld [vmem:[#allocation13 + $0x3e0] sm:$0xff] }
 0x36e   :  { %v4439_v61 = vcombine.high %v1374_v58, %v1378_v59  ;;  %v4438_v63 = vcombine.low %v1374_v58, %v1378_v59  ;;  %v1414_v58 = vld [vmem:[#allocation13 + $0x500] sm:$0xff] }
 0x36f   :  { %2847 = vmatpush1.bf16.msra.mxu1 %v4374_v0  ;;  %2929 = vmatpush1.bf16.msra.mxu0 %v4376_v1  ;;  %v4440_v0 = vcombine.low %v1375_v60, %v1379_v62  ;;  %v4441_v1 = vcombine.high %v1375_v60, %v1379_v62  ;;  %v1418_v59 = vld [vmem:[#allocation13 + $0x520] sm:$0xff]  ;;  %v1415_v60 = vld [vmem:[#allocation13 + $0x508] sm:$0xff]  ;;  %v4470_v62 = vcombine.low %v1406_v50, %v1410_v51 }
 0x370   :  { %2848 = vmatprep.subr.bf16.mxu1 %v4383_v2  ;;  %2930 = vmatprep.subr.bf16.mxu0 %v4385_v6  ;;  %v1382_v2 = vld [vmem:[#allocation13 + $0x400] sm:$0xff] }
 0x371   :  { %v1386_v6 = vld [vmem:[#allocation13 + $0x420] sm:$0xff] }
 0x372   :  { %v4447_v9 = vcombine.high %v1382_v2, %v1386_v6  ;;  %v4446_v11 = vcombine.low %v1382_v2, %v1386_v6  ;;  %v1422_v2 = vld [vmem:[#allocation13 + $0x540] sm:$0xff] }
 0x373   :  { %2849 = vmatpush1.bf16.msra.mxu1 %v4382_v12  ;;  %2931 = vmatpush1.bf16.msra.mxu0 %v4384_v13  ;;  %v4448_v12 = vcombine.low %v1383_v8, %v1387_v10  ;;  %v4449_v13 = vcombine.high %v1383_v8, %v1387_v10  ;;  %v1426_v6 = vld [vmem:[#allocation13 + $0x560] sm:$0xff]  ;;  %v1423_v8 = vld [vmem:[#allocation13 + $0x548] sm:$0xff]  ;;  %v4478_v10 = vcombine.low %v1414_v58, %v1418_v59 }
 0x374   :  { %2850 = vmatprep.subr.bf16.mxu1 %v4391_v14  ;;  %2932 = vmatprep.subr.bf16.mxu0 %v4393_v16  ;;  %v5726_v14 = vld [vmem:[%s5879_s8] sm:$0xf]  ;;  %v838_v16 = vsub.s32 3, %v5693_v4 }
 0x375   :  { %v827_v15 = vrot.slane %v5726_v14, %v5696_v5  ;;  %v831_v17 = vrot.slane %v5726_v14, %v5702_v7 }
 0x376   :  { %v839_v18 = vrot.slane %v5726_v14, %v838_v16 }
 0x377   :  { %2851 = vmatpush1.bf16.msra.mxu1 %v4390_v20  ;;  %2933 = vmatpush1.bf16.msra.mxu0 %v4392_v21 }
 0x378   :  { %2852 = vmatprep.subr.bf16.mxu1 %v4399_v22  ;;  %2934 = vmatprep.subr.bf16.mxu0 %v4401_v23 }
 0x37b   :  { %2853 = vmatpush1.bf16.msra.mxu1 %v4398_v28  ;;  %2935 = vmatpush1.bf16.msra.mxu0 %v4400_v29 }
 0x37c   :  { %2854 = vmatprep.subr.bf16.mxu1 %v4407_v30  ;;  %2936 = vmatprep.subr.bf16.mxu0 %v4409_v31 }
 0x37f   :  { %2855 = vmatpush1.bf16.msra.mxu1 %v4406_v36  ;;  %2937 = vmatpush1.bf16.msra.mxu0 %v4408_v37  ;;  %v1395_v36 = vld [vmem:[#allocation13 + $0x468] sm:$0xff] }
 0x380   :  { %2856 = vmatprep.subr.bf16.mxu1 %v4415_v38  ;;  %2938 = vmatprep.subr.bf16.mxu0 %v4417_v39  ;;  %v1398_v39 = vld [vmem:[#allocation13 + $0x480] sm:$0xff]  ;;  %v4457_v41 = vcombine.high %v1391_v35, %v1395_v36 }
 0x381   :  { %v4462_v54 = vcombine.low %v1398_v39, %v1402_v42 }
 0x383   :  { %2857 = vmatpush1.bf16.msra.mxu1 %v4414_v44  ;;  %2939 = vmatpush1.bf16.msra.mxu0 %v4416_v45  ;;  %v1403_v44 = vld [vmem:[#allocation13 + $0x4a8] sm:$0xff] }
 0x384   :  { %2858 = vmatprep.subr.bf16.mxu1 %v4423_v46  ;;  %2940 = vmatprep.subr.bf16.mxu0 %v4425_v47  ;;  %v4454_v46 = vcombine.low %v1390_v32, %v1394_v34  ;;  %v4456_v47 = vcombine.low %v1391_v35, %v1395_v36  ;;  %v1450_v34 = vld [vmem:[#allocation13 + $0x620] sm:$0xff]  ;;  %v1447_v35 = vld [vmem:[#allocation13 + $0x608] sm:$0xff] }
 0x385   :  { %v1451_v36 = vld [vmem:[#allocation13 + $0x628] sm:$0xff] }
 0x387   :  { %2859 = vmatpush1.bf16.msra.mxu1 %v4422_v48  ;;  %2941 = vmatpush1.bf16.msra.mxu0 %v4424_v49  ;;  %v4463_v48 = vcombine.high %v1398_v39, %v1402_v42  ;;  %v4465_v49 = vcombine.high %v1399_v43, %v1403_v44  ;;  %v4513_v42 = vcombine.high %v1447_v35, %v1451_v36 }
 0x388   :  { %2860 = vmatprep.subr.bf16.mxu1 %v4431_v53  ;;  %2942 = vmatprep.subr.bf16.mxu0 %v4433_v57  ;;  %v1411_v53 = vld [vmem:[#allocation13 + $0x4e8] sm:$0xff] }
 0x389   :  { %v4473_v57 = vcombine.high %v1407_v52, %v1411_v53 }
 0x38b   :  { %2861 = vmatpush1.bf16.msra.mxu1 %v4430_v55  ;;  %2943 = vmatpush1.bf16.msra.mxu0 %v4432_v56  ;;  %v4464_v55 = vcombine.low %v1399_v43, %v1403_v44  ;;  %v4471_v56 = vcombine.high %v1406_v50, %v1410_v51  ;;  %v1454_v43 = vld [vmem:[#allocation13 + $0x640] sm:$0xff] }
 0x38c   :  { %2862 = vmatprep.subr.bf16.mxu1 %v4439_v61  ;;  %2944 = vmatprep.subr.bf16.mxu0 %v4441_v1  ;;  %v1419_v61 = vld [vmem:[#allocation13 + $0x528] sm:$0xff]  ;;  %v1458_v44 = vld [vmem:[#allocation13 + $0x660] sm:$0xff] }
 0x38d   :  { %v4481_v1 = vcombine.high %v1415_v60, %v1419_v61  ;;  %v4519_v50 = vcombine.high %v1454_v43, %v1458_v44 }
 0x38f   :  { %2863 = vmatpush1.bf16.msra.mxu1 %v4438_v63  ;;  %2945 = vmatpush1.bf16.msra.mxu0 %v4440_v0  ;;  %v4472_v63 = vcombine.low %v1407_v52, %v1411_v53  ;;  %v4479_v0 = vcombine.high %v1414_v58, %v1418_v59  ;;  %v1462_v52 = vld [vmem:[#allocation13 + $0x680] sm:$0xff] }
 0x390   :  { %2873 = vmatprep.subr.bf16.mxu1 %v4447_v9  ;;  %2955 = vmatprep.subr.bf16.mxu0 %v4449_v13  ;;  %v1427_v9 = vld [vmem:[#allocation13 + $0x568] sm:$0xff]  ;;  %v1466_v53 = vld [vmem:[#allocation13 + $0x6a0] sm:$0xff] }
 0x391   :  { %v4489_v13 = vcombine.high %v1423_v8, %v1427_v9  ;;  %v4527_v58 = vcombine.high %v1462_v52, %v1466_v53 }
 0x425   :  { %v1198_v19 = vpop.f32.mrb[4].mxu1  ;;  %v5736_v20 = vpop.f32.mrb[8].mxu0 }
 0x426   :  { %v1199_v21 = vadd.f32 %v1198_v19, %v827_v15  ;;  %v1200_v22 = vpop.f32.mrb[5].mxu1  ;;  %v1241_v23 = vpop.f32.mrb[9].mxu0  ;;  %v1430_v15 = vld [vmem:[#allocation13 + $0x580] sm:$0xff]  ;;  %v1435_v19 = vld [vmem:[#allocation13 + $0x5a8] sm:$0xff] }
 0x427   :  { %v1201_v24 = vadd.f32 %v1200_v22, %v831_v17  ;;  %v1242_v25 = vadd.f32 %v1241_v23, %v839_v18  ;;  %v1202_v26 = vpop.f32.mrb[6].mxu1  ;;  %v1243_v27 = vpop.f32.mrb[10].mxu0  ;;  %v1434_v17 = vld [vmem:[#allocation13 + $0x5a0] sm:$0xff]  ;;  %v1431_v18 = vld [vmem:[#allocation13 + $0x588] sm:$0xff]  ;;  %v4488_v22 = vcombine.low %v1423_v8, %v1427_v9 }
 0x428   :  { %v1246_v28 = vmax.f32 %v1199_v21, 0.0  ;;  %v1203_v29 = vpop.f32.mrb[7].mxu1  ;;  %v1244_v30 = vpop.f32.mrb[11].mxu0  ;;  %v4486_v21 = vcombine.low %v1422_v2, %v1426_v6  ;;  %v4495_v23 = vcombine.high %v1430_v15, %v1434_v17  ;;  %v1442_v26 = vld [vmem:[#allocation13 + $0x5e0] sm:$0xff]  ;;  %v1439_v27 = vld [vmem:[#allocation13 + $0x5c8] sm:$0xff] }
 0x429   :  { %v1247_v31 = vmax.f32 %v1201_v24, 0.0  ;;  %v1249_v33 = vmax.f32 %v1242_v25, 0.0  ;;  %v4497_v24 = vcombine.high %v1431_v18, %v1435_v19  ;;  %v1438_v25 = vld [vmem:[#allocation13 + $0x5c0] sm:$0xff]  ;;  %v4494_v29 = vcombine.low %v1430_v15, %v1434_v17 }
 0x42a   :  { %v5740_v38 = vpack.c.bf16 %v1246_v28, %v1246_v28  ;;  %v1443_v28 = vld [vmem:[#allocation13 + $0x5e8] sm:$0xff]  ;;  %v4496_v30 = vcombine.low %v1431_v18, %v1435_v19  ;;  %v4502_v39 = vcombine.low %v1438_v25, %v1442_v26  ;;  %v1478_v8 = vld [vmem:[#allocation13 + $0x700] sm:$0xff] }
 0x42b   :  { %v5738_v37 = vpack.c.bf16 %v1247_v31, %v1247_v31  ;;  %v5744_v45 = vpack.c.bf16 %v1249_v33, %v1249_v33  ;;  %v4503_v31 = vcombine.high %v1438_v25, %v1442_v26  ;;  %v4505_v32 = vcombine.high %v1439_v27, %v1443_v28  ;;  %v1446_v33 = vld [vmem:[#allocation13 + $0x600] sm:$0xff] }
 0x42c   :  { %v1482_v9 = vld [vmem:[#allocation13 + $0x720] sm:$0xff]  ;;  %v834_v25 = vsub.s32 2, %v5693_v4 }
 0x42d   :  { %2864 = vmatprep.mubr.bf16.mxu1 %v5738_v37  ;;  %2946 = vmatprep.mubr.bf16.mxu0 %v5738_v37  ;;  %v4543_v15 = vcombine.high %v1478_v8, %v1482_v9  ;;  %v1486_v18 = vld [vmem:[#allocation13 + $0x740] sm:$0xff] }
 0x42e   :  { %2865 = vmatmul.mubr.bf16.vlgmr.msra.gmra.mrb[8].mxu1 %v5740_v38  ;;  %2947 = vmatmul.mubr.bf16.vlgmr.msra.gmra.mrb[12].mxu0 %v5740_v38  ;;  %v1490_v19 = vld [vmem:[#allocation13 + $0x760] sm:$0xff] }
 0x42f   :  { %2874 = vmatpush1.bf16.msra.mxu1 %v4446_v11  ;;  %2956 = vmatpush1.bf16.msra.mxu0 %v4448_v12  ;;  %v4480_v11 = vcombine.low %v1415_v60, %v1419_v61  ;;  %v4487_v12 = vcombine.high %v1422_v2, %v1426_v6  ;;  %v1470_v60 = vld [vmem:[#allocation13 + $0x6c0] sm:$0xff]  ;;  %v4551_v26 = vcombine.high %v1486_v18, %v1490_v19 }
 0x430   :  { %2905 = vmatprep.mubr.bf16.mxu1 %v5744_v45  ;;  %2987 = vmatprep.mubr.bf16.mxu0 %v5744_v45  ;;  %v1474_v61 = vld [vmem:[#allocation13 + $0x6e0] sm:$0xff] }
 0x431   :  { %2875 = vmatprep.subr.bf16.mxu1 %v4455_v40  ;;  %2957 = vmatprep.subr.bf16.mxu0 %v4457_v41  ;;  %v4504_v40 = vcombine.low %v1439_v27, %v1443_v28  ;;  %v4511_v41 = vcombine.high %v1446_v33, %v1450_v34  ;;  %v4535_v2 = vcombine.high %v1470_v60, %v1474_v61  ;;  %v1494_v28 = vld [vmem:[#allocation13 + $0x780] sm:$0xff] }
 0x433   :  { %2876 = vmatpush1.bf16.msra.mxu1 %v4454_v46  ;;  %2958 = vmatpush1.bf16.msra.mxu0 %v4456_v47  ;;  %v1455_v46 = vld [vmem:[#allocation13 + $0x648] sm:$0xff] }
 0x434   :  { %2877 = vmatprep.subr.bf16.mxu1 %v4463_v48  ;;  %2959 = vmatprep.subr.bf16.mxu0 %v4465_v49  ;;  %v1459_v47 = vld [vmem:[#allocation13 + $0x668] sm:$0xff]  ;;  %v4510_v48 = vcombine.low %v1446_v33, %v1450_v34  ;;  %v4512_v49 = vcombine.low %v1447_v35, %v1451_v36  ;;  %v835_v34 = vrot.slane %v5726_v14, %v834_v25  ;;  %v1260_v14 = vld [vmem:[#allocation13 + $0x30] sm:$0xff] }
 0x435   :  { %v4521_v51 = vcombine.high %v1455_v46, %v1459_v47 }
 0x437   :  { %2878 = vmatpush1.bf16.msra.mxu1 %v4462_v54  ;;  %2960 = vmatpush1.bf16.msra.mxu0 %v4464_v55  ;;  %v1463_v54 = vld [vmem:[#allocation13 + $0x688] sm:$0xff] }
 0x438   :  { %2879 = vmatprep.subr.bf16.mxu1 %v4471_v56  ;;  %2961 = vmatprep.subr.bf16.mxu0 %v4473_v57  ;;  %v1467_v55 = vld [vmem:[#allocation13 + $0x6a8] sm:$0xff]  ;;  %v4518_v56 = vcombine.low %v1454_v43, %v1458_v44  ;;  %v4520_v57 = vcombine.low %v1455_v46, %v1459_v47  ;;  %v1240_v46 = vadd.f32 %v5736_v20, %v835_v34  ;;  %v1265_v20 = vld [vmem:[#allocation13 + $0x58] sm:$0xff] }
 0x439   :  { %v4529_v59 = vcombine.high %v1463_v54, %v1467_v55  ;;  %v1297_v34 = vld [vmem:[#allocation13 + $0x158] sm:$0xff] }
 0x43b   :  { %2880 = vmatpush1.bf16.msra.mxu1 %v4470_v62  ;;  %2962 = vmatpush1.bf16.msra.mxu0 %v4472_v63  ;;  %v1471_v62 = vld [vmem:[#allocation13 + $0x6c8] sm:$0xff] }
 0x43c   :  { %2881 = vmatprep.subr.bf16.mxu1 %v4479_v0  ;;  %2963 = vmatprep.subr.bf16.mxu0 %v4481_v1  ;;  %v1475_v63 = vld [vmem:[#allocation13 + $0x6e8] sm:$0xff]  ;;  %v4526_v0 = vcombine.low %v1462_v52, %v1466_v53  ;;  %v4528_v1 = vcombine.low %v1463_v54, %v1467_v55  ;;  %v1248_v54 = vmax.f32 %v1240_v46, 0.0  ;;  %v1309_v46 = vld [vmem:[#allocation13 + $0x1b8] sm:$0xff] }
 0x43d   :  { %v4537_v6 = vcombine.high %v1471_v62, %v1475_v63 }
 0x43f   :  { %2882 = vmatpush1.bf16.msra.mxu1 %v4478_v10  ;;  %2964 = vmatpush1.bf16.msra.mxu0 %v4480_v11  ;;  %v1479_v10 = vld [vmem:[#allocation13 + $0x708] sm:$0xff] }
 0x440   :  { %2883 = vmatprep.subr.bf16.mxu1 %v4487_v12  ;;  %2965 = vmatprep.subr.bf16.mxu0 %v4489_v13  ;;  %v1483_v11 = vld [vmem:[#allocation13 + $0x728] sm:$0xff]  ;;  %v4534_v12 = vcombine.low %v1470_v60, %v1474_v61  ;;  %v4536_v13 = vcombine.low %v1471_v62, %v1475_v63  ;;  %v5755_v61 = vpack.c.bf16 %v1248_v54, %v1248_v54 }
 0x441   :  { %v4545_v17 = vcombine.high %v1479_v10, %v1483_v11 }
 0x443   :  { %2884 = vmatpush1.bf16.msra.mxu1 %v4486_v21  ;;  %2966 = vmatpush1.bf16.msra.mxu0 %v4488_v22  ;;  %v1487_v21 = vld [vmem:[#allocation13 + $0x748] sm:$0xff] }
 0x444   :  { %2885 = vmatprep.subr.bf16.mxu1 %v4495_v23  ;;  %2967 = vmatprep.subr.bf16.mxu0 %v4497_v24  ;;  %v1491_v22 = vld [vmem:[#allocation13 + $0x768] sm:$0xff]  ;;  %v4542_v23 = vcombine.low %v1478_v8, %v1482_v9  ;;  %v4544_v24 = vcombine.low %v1479_v10, %v1483_v11  ;;  %v1277_v8 = vld [vmem:[#allocation13 + $0xb8] sm:$0xff] }
 0x445   :  { %v4553_v27 = vcombine.high %v1487_v21, %v1491_v22  ;;  %v4552_v33 = vcombine.low %v1487_v21, %v1491_v22 }
 0x447   :  { %2886 = vmatpush1.bf16.msra.mxu1 %v4494_v29  ;;  %2968 = vmatpush1.bf16.msra.mxu0 %v4496_v30  ;;  %v1498_v29 = vld [vmem:[#allocation13 + $0x7a0] sm:$0xff]  ;;  %v1495_v30 = vld [vmem:[#allocation13 + $0x788] sm:$0xff] }
 0x448   :  { %2887 = vmatprep.subr.bf16.mxu1 %v4503_v31  ;;  %2969 = vmatprep.subr.bf16.mxu0 %v4505_v32  ;;  %v1499_v31 = vld [vmem:[#allocation13 + $0x7a8] sm:$0xff]  ;;  %v4550_v32 = vcombine.low %v1486_v18, %v1490_v19  ;;  %v4559_v35 = vcombine.high %v1494_v28, %v1498_v29  ;;  %v4558_v43 = vcombine.low %v1494_v28, %v1498_v29  ;;  %v1285_v18 = vld [vmem:[#allocation13 + $0xf8] sm:$0xff] }
 0x449   :  { %v4561_v36 = vcombine.high %v1495_v30, %v1499_v31  ;;  %v4560_v44 = vcombine.low %v1495_v30, %v1499_v31 }
 0x44b   :  { %2888 = vmatpush1.bf16.msra.mxu1 %v4502_v39  ;;  %2970 = vmatpush1.bf16.msra.mxu0 %v4504_v40  ;;  %v1502_v39 = vld [vmem:[#allocation13 + $0x7c0] sm:$0xff] }
 0x44c   :  { %2889 = vmatprep.subr.bf16.mxu1 %v4511_v41  ;;  %2971 = vmatprep.subr.bf16.mxu0 %v4513_v42  ;;  %v1506_v40 = vld [vmem:[#allocation13 + $0x7e0] sm:$0xff]  ;;  %v1503_v41 = vld [vmem:[#allocation13 + $0x7c8] sm:$0xff] }
 0x44d   :  { %v1507_v42 = vld [vmem:[#allocation13 + $0x7e8] sm:$0xff]  ;;  %v4567_v47 = vcombine.high %v1502_v39, %v1506_v40  ;;  %v4566_v52 = vcombine.low %v1502_v39, %v1506_v40 }
 0x44e   :  { %v4568_v53 = vcombine.low %v1503_v41, %v1507_v42 }
 0x44f   :  { %2890 = vmatpush1.bf16.msra.mxu1 %v4510_v48  ;;  %2972 = vmatpush1.bf16.msra.mxu0 %v4512_v49  ;;  %v4569_v48 = vcombine.high %v1503_v41, %v1507_v42  ;;  %v1256_v49 = vld [vmem:[#allocation13 + $0x10] sm:$0xff] }
 0x450   :  { %2891 = vmatprep.subr.bf16.mxu1 %v4519_v50  ;;  %2973 = vmatprep.subr.bf16.mxu0 %v4521_v51  ;;  %v1257_v50 = vld [vmem:[#allocation13 + $0x18] sm:$0xff]  ;;  %v4323_v55 = vcombine.high %v1256_v49, %v1260_v14  ;;  %v4322_v60 = vcombine.low %v1256_v49, %v1260_v14  ;;  %v1304_v42 = vld [vmem:[#allocation13 + $0x190] sm:$0xff] }
 0x451   :  { %v1261_v51 = vld [vmem:[#allocation13 + $0x38] sm:$0xff] }
 0x452   :  { %v4324_v62 = vcombine.low %v1257_v50, %v1261_v51 }
 0x453   :  { %2892 = vmatpush1.bf16.msra.mxu1 %v4518_v56  ;;  %2974 = vmatpush1.bf16.msra.mxu0 %v4520_v57  ;;  %v4325_v56 = vcombine.high %v1257_v50, %v1261_v51  ;;  %v1264_v57 = vld [vmem:[#allocation13 + $0x50] sm:$0xff] }
 0x454   :  { %2893 = vmatprep.subr.bf16.mxu1 %v4527_v58  ;;  %2975 = vmatprep.subr.bf16.mxu0 %v4529_v59  ;;  %v1268_v58 = vld [vmem:[#allocation13 + $0x70] sm:$0xff]  ;;  %v1269_v59 = vld [vmem:[#allocation13 + $0x78] sm:$0xff] }
 0x455   :  { %v4331_v63 = vcombine.high %v1264_v57, %v1268_v58  ;;  %v4330_v9 = vcombine.low %v1264_v57, %v1268_v58  ;;  %v4332_v10 = vcombine.low %v1265_v20, %v1269_v59  ;;  %v1312_v50 = vld [vmem:[#allocation13 + $0x1d0] sm:$0xff] }
 0x456   :  { %v1316_v51 = vld [vmem:[#allocation13 + $0x1f0] sm:$0xff] }
 0x457   :  { %2894 = vmatpush1.bf16.msra.mxu1 %v4526_v0  ;;  %2976 = vmatpush1.bf16.msra.mxu0 %v4528_v1  ;;  %v4333_v0 = vcombine.high %v1265_v20, %v1269_v59  ;;  %v1272_v1 = vld [vmem:[#allocation13 + $0x90] sm:$0xff]  ;;  %v1321_v59 = vld [vmem:[#allocation13 + $0x218] sm:$0xff] }
 0x458   :  { %2895 = vmatprep.subr.bf16.mxu1 %v4535_v2  ;;  %2977 = vmatprep.subr.bf16.mxu0 %v4537_v6  ;;  %v1276_v2 = vld [vmem:[#allocation13 + $0xb0] sm:$0xff]  ;;  %v1273_v6 = vld [vmem:[#allocation13 + $0x98] sm:$0xff] }
 0x459   :  { %v4339_v11 = vcombine.high %v1272_v1, %v1276_v2  ;;  %v4338_v19 = vcombine.low %v1272_v1, %v1276_v2  ;;  %v4340_v21 = vcombine.low %v1273_v6, %v1277_v8  ;;  %v1320_v58 = vld [vmem:[#allocation13 + $0x210] sm:$0xff] }
 0x45a   :  { %v1324_v20 = vld [vmem:[#allocation13 + $0x230] sm:$0xff] }
 0x45b   :  { %2896 = vmatpush1.bf16.msra.mxu1 %v4534_v12  ;;  %2978 = vmatpush1.bf16.msra.mxu0 %v4536_v13  ;;  %v4341_v12 = vcombine.high %v1273_v6, %v1277_v8  ;;  %v1280_v13 = vld [vmem:[#allocation13 + $0xd0] sm:$0xff]  ;;  %v1329_v8 = vld [vmem:[#allocation13 + $0x258] sm:$0xff] }
 0x45c   :  { %2897 = vmatprep.subr.bf16.mxu1 %v4543_v15  ;;  %2979 = vmatprep.subr.bf16.mxu0 %v4545_v17  ;;  %v1284_v15 = vld [vmem:[#allocation13 + $0xf0] sm:$0xff]  ;;  %v1281_v17 = vld [vmem:[#allocation13 + $0xd8] sm:$0xff] }
 0x45d   :  { %v4347_v22 = vcombine.high %v1280_v13, %v1284_v15  ;;  %v4346_v28 = vcombine.low %v1280_v13, %v1284_v15  ;;  %v4348_v29 = vcombine.low %v1281_v17, %v1285_v18  ;;  %v1328_v2 = vld [vmem:[#allocation13 + $0x250] sm:$0xff] }
 0x45e   :  { %v1332_v6 = vld [vmem:[#allocation13 + $0x270] sm:$0xff] }
 0x45f   :  { %2898 = vmatpush1.bf16.msra.mxu1 %v4542_v23  ;;  %2980 = vmatpush1.bf16.msra.mxu0 %v4544_v24  ;;  %v4349_v23 = vcombine.high %v1281_v17, %v1285_v18  ;;  %v1288_v24 = vld [vmem:[#allocation13 + $0x110] sm:$0xff]  ;;  %v1337_v18 = vld [vmem:[#allocation13 + $0x298] sm:$0xff] }
 0x460   :  { %2899 = vmatprep.subr.bf16.mxu1 %v4551_v26  ;;  %2981 = vmatprep.subr.bf16.mxu0 %v4553_v27  ;;  %v1292_v26 = vld [vmem:[#allocation13 + $0x130] sm:$0xff]  ;;  %v1293_v27 = vld [vmem:[#allocation13 + $0x138] sm:$0xff] }
 0x461   :  { %v4355_v30 = vcombine.high %v1288_v24, %v1292_v26  ;;  %v1336_v15 = vld [vmem:[#allocation13 + $0x290] sm:$0xff] }
 0x462   :  { %v1340_v17 = vld [vmem:[#allocation13 + $0x2b0] sm:$0xff] }
 0x463   :  { %2900 = vmatpush1.bf16.msra.mxu1 %v4550_v32  ;;  %2982 = vmatpush1.bf16.msra.mxu0 %v4552_v33  ;;  %v1296_v32 = vld [vmem:[#allocation13 + $0x150] sm:$0xff] }
 0x464   :  { %2901 = vmatprep.subr.bf16.mxu1 %v4559_v35  ;;  %2983 = vmatprep.subr.bf16.mxu0 %v4561_v36  ;;  %v1300_v33 = vld [vmem:[#allocation13 + $0x170] sm:$0xff]  ;;  %v1301_v35 = vld [vmem:[#allocation13 + $0x178] sm:$0xff]  ;;  %v4354_v36 = vcombine.low %v1288_v24, %v1292_v26 }
 0x465   :  { %v4363_v40 = vcombine.high %v1296_v32, %v1300_v33  ;;  %v4365_v41 = vcombine.high %v1297_v34, %v1301_v35  ;;  %v1344_v26 = vld [vmem:[#allocation13 + $0x2d0] sm:$0xff] }
 0x467   :  { %2902 = vmatpush1.bf16.msra.mxu1 %v4558_v43  ;;  %2984 = vmatpush1.bf16.msra.mxu0 %v4560_v44  ;;  %v1308_v43 = vld [vmem:[#allocation13 + $0x1b0] sm:$0xff]  ;;  %v1305_v44 = vld [vmem:[#allocation13 + $0x198] sm:$0xff] }
 0x468   :  { %2903 = vmatprep.subr.bf16.mxu1 %v4567_v47  ;;  %2985 = vmatprep.subr.bf16.mxu0 %v4569_v48  ;;  %v4362_v47 = vcombine.low %v1296_v32, %v1300_v33  ;;  %v4364_v48 = vcombine.low %v1297_v34, %v1301_v35  ;;  %v4371_v49 = vcombine.high %v1304_v42, %v1308_v43  ;;  %v1352_v33 = vld [vmem:[#allocation13 + $0x310] sm:$0xff]  ;;  %v1353_v35 = vld [vmem:[#allocation13 + $0x318] sm:$0xff] }
 0x469   :  { %v4373_v14 = vcombine.high %v1305_v44, %v1309_v46  ;;  %v4370_v54 = vcombine.low %v1304_v42, %v1308_v43  ;;  %v1356_v34 = vld [vmem:[#allocation13 + $0x330] sm:$0xff] }
 0x46a   :  { %v1360_v43 = vld [vmem:[#allocation13 + $0x350] sm:$0xff] }
 0x46b   :  { %2904 = vmatpush1.bf16.msra.mxu1 %v4566_v52  ;;  %2986 = vmatpush1.bf16.msra.mxu0 %v4568_v53  ;;  %v1313_v52 = vld [vmem:[#allocation13 + $0x1d8] sm:$0xff] }
 0x46c   :  { %2996 = vmatprep.subr.bf16.mxu1 %v4323_v55  ;;  %3078 = vmatprep.subr.bf16.mxu0 %v4325_v56  ;;  %v1317_v53 = vld [vmem:[#allocation13 + $0x1f8] sm:$0xff]  ;;  %v4372_v55 = vcombine.low %v1305_v44, %v1309_v46  ;;  %v4379_v56 = vcombine.high %v1312_v50, %v1316_v51  ;;  %v1364_v44 = vld [vmem:[#allocation13 + $0x370] sm:$0xff] }
 0x46d   :  { %v4381_v57 = vcombine.high %v1313_v52, %v1317_v53  ;;  %v1361_v46 = vld [vmem:[#allocation13 + $0x358] sm:$0xff] }
 0x46e   :  { %2906 = vmatmul.mubr.bf16.vlgmr.msra.gmra.mrb[8].mxu1 %v5755_v61  ;;  %2988 = vmatmul.mubr.bf16.vlgmr.msra.gmra.mrb[12].mxu0 %v5755_v61 }
 0x46f   :  { %2997 = vmatpush1.bf16.msra.mxu1 %v4322_v60  ;;  %3028 = vmatprep.mubr.bf16.mxu1 %v5738_v37  ;;  %v1325_v60 = vld [vmem:[#allocation13 + $0x238] sm:$0xff] }
 0x470   :  { %3079 = vmatpush1.bf16.msra.mxu0 %v4324_v62  ;;  %3110 = vmatprep.mubr.bf16.mxu0 %v5738_v37  ;;  %v1289_v37 = vld [vmem:[#allocation13 + $0x118] sm:$0xff]  ;;  %v4378_v62 = vcombine.low %v1312_v50, %v1316_v51  ;;  %v4389_v1 = vcombine.high %v1321_v59, %v1325_v60  ;;  %v1368_v51 = vld [vmem:[#allocation13 + $0x390] sm:$0xff] }
 0x471   :  { %2998 = vmatprep.subr.bf16.mxu1 %v4331_v63  ;;  %3080 = vmatprep.subr.bf16.mxu0 %v4333_v0  ;;  %v4357_v31 = vcombine.high %v1289_v37, %v1293_v27  ;;  %v4356_v39 = vcombine.low %v1289_v37, %v1293_v27  ;;  %v4380_v63 = vcombine.low %v1313_v52, %v1317_v53  ;;  %v1348_v37 = vld [vmem:[#allocation13 + $0x2f0] sm:$0xff]  ;;  %v1345_v27 = vld [vmem:[#allocation13 + $0x2d8] sm:$0xff] }
 0x472   :  { %v4387_v0 = vcombine.high %v1320_v58, %v1324_v20  ;;  %v1372_v52 = vld [vmem:[#allocation13 + $0x3b0] sm:$0xff]  ;;  %v1369_v53 = vld [vmem:[#allocation13 + $0x398] sm:$0xff] }
 0x473   :  { %2999 = vmatpush1.bf16.msra.mxu1 %v4330_v9  ;;  %v1333_v9 = vld [vmem:[#allocation13 + $0x278] sm:$0xff] }
 0x474   :  { %3081 = vmatpush1.bf16.msra.mxu0 %v4332_v10  ;;  %3000 = vmatprep.subr.bf16.mxu1 %v4339_v11  ;;  %v4386_v10 = vcombine.low %v1320_v58, %v1324_v20  ;;  %v4388_v11 = vcombine.low %v1321_v59, %v1325_v60  ;;  %v4397_v13 = vcombine.high %v1329_v8, %v1333_v9  ;;  %v1376_v20 = vld [vmem:[#allocation13 + $0x3d0] sm:$0xff]  ;;  %v1377_v60 = vld [vmem:[#allocation13 + $0x3d8] sm:$0xff] }
 0x475   :  { %3082 = vmatprep.subr.bf16.mxu0 %v4341_v12  ;;  %v4395_v12 = vcombine.high %v1328_v2, %v1332_v6  ;;  %v1380_v59 = vld [vmem:[#allocation13 + $0x3f0] sm:$0xff] }
 0x477   :  { %3001 = vmatpush1.bf16.msra.mxu1 %v4338_v19  ;;  %v1341_v19 = vld [vmem:[#allocation13 + $0x2b8] sm:$0xff] }
 0x478   :  { %3083 = vmatpush1.bf16.msra.mxu0 %v4340_v21  ;;  %3002 = vmatprep.subr.bf16.mxu1 %v4347_v22  ;;  %v4394_v21 = vcombine.low %v1328_v2, %v1332_v6  ;;  %v4396_v22 = vcombine.low %v1329_v8, %v1333_v9  ;;  %v4405_v24 = vcombine.high %v1337_v18, %v1341_v19  ;;  %v1384_v6 = vld [vmem:[#allocation13 + $0x410] sm:$0xff]  ;;  %v1385_v9 = vld [vmem:[#allocation13 + $0x418] sm:$0xff] }
 0x479   :  { %3084 = vmatprep.subr.bf16.mxu0 %v4349_v23  ;;  %v4403_v23 = vcombine.high %v1336_v15, %v1340_v17  ;;  %v1388_v8 = vld [vmem:[#allocation13 + $0x430] sm:$0xff] }
 0x47b   :  { %3003 = vmatpush1.bf16.msra.mxu1 %v4346_v28  ;;  %v1349_v28 = vld [vmem:[#allocation13 + $0x2f8] sm:$0xff] }
 0x47c   :  { %3085 = vmatpush1.bf16.msra.mxu0 %v4348_v29  ;;  %3004 = vmatprep.subr.bf16.mxu1 %v4355_v30  ;;  %v4402_v29 = vcombine.low %v1336_v15, %v1340_v17  ;;  %v4404_v30 = vcombine.low %v1337_v18, %v1341_v19  ;;  %v4413_v32 = vcombine.high %v1345_v27, %v1349_v28  ;;  %v1392_v17 = vld [vmem:[#allocation13 + $0x450] sm:$0xff] }
 0x47d   :  { %3086 = vmatprep.subr.bf16.mxu0 %v4357_v31  ;;  %v4411_v31 = vcombine.high %v1344_v26, %v1348_v37  ;;  %v1396_v18 = vld [vmem:[#allocation13 + $0x470] sm:$0xff]  ;;  %v4450_v19 = vcombine.low %v1384_v6, %v1388_v8 }
 0x47f   :  { %3005 = vmatpush1.bf16.msra.mxu1 %v4354_v36  ;;  %v1357_v36 = vld [vmem:[#allocation13 + $0x338] sm:$0xff] }
 0x480   :  { %3087 = vmatpush1.bf16.msra.mxu0 %v4356_v39  ;;  %3006 = vmatprep.subr.bf16.mxu1 %v4363_v40  ;;  %v4410_v39 = vcombine.low %v1344_v26, %v1348_v37  ;;  %v4412_v40 = vcombine.low %v1345_v27, %v1349_v28  ;;  %v4421_v42 = vcombine.high %v1353_v35, %v1357_v36  ;;  %v1400_v26 = vld [vmem:[#allocation13 + $0x490] sm:$0xff]  ;;  %v1401_v28 = vld [vmem:[#allocation13 + $0x498] sm:$0xff] }
 0x481   :  { %3088 = vmatprep.subr.bf16.mxu0 %v4365_v41  ;;  %v4419_v41 = vcombine.high %v1352_v33, %v1356_v34  ;;  %v1404_v37 = vld [vmem:[#allocation13 + $0x4b0] sm:$0xff] }
 0x483   :  { %3007 = vmatpush1.bf16.msra.mxu1 %v4362_v47  ;;  %v1365_v47 = vld [vmem:[#allocation13 + $0x378] sm:$0xff] }
 0x484   :  { %3089 = vmatpush1.bf16.msra.mxu0 %v4364_v48  ;;  %3008 = vmatprep.subr.bf16.mxu1 %v4371_v49  ;;  %v4418_v48 = vcombine.low %v1352_v33, %v1356_v34  ;;  %v4420_v49 = vcombine.low %v1353_v35, %v1357_v36  ;;  %v4429_v50 = vcombine.high %v1361_v46, %v1365_v47  ;;  %v1408_v34 = vld [vmem:[#allocation13 + $0x4d0] sm:$0xff]  ;;  %v1409_v36 = vld [vmem:[#allocation13 + $0x4d8] sm:$0xff] }
 0x485   :  { %3090 = vmatprep.subr.bf16.mxu0 %v4373_v14  ;;  %v4427_v14 = vcombine.high %v1360_v43, %v1364_v44  ;;  %v1412_v35 = vld [vmem:[#allocation13 + $0x4f0] sm:$0xff] }
 0x487   :  { %3009 = vmatpush1.bf16.msra.mxu1 %v4370_v54  ;;  %v1373_v54 = vld [vmem:[#allocation13 + $0x3b8] sm:$0xff] }
 0x488   :  { %3091 = vmatpush1.bf16.msra.mxu0 %v4372_v55  ;;  %3010 = vmatprep.subr.bf16.mxu1 %v4379_v56  ;;  %v4426_v55 = vcombine.low %v1360_v43, %v1364_v44  ;;  %v4428_v56 = vcombine.low %v1361_v46, %v1365_v47  ;;  %v4437_v58 = vcombine.high %v1369_v53, %v1373_v54  ;;  %v1416_v43 = vld [vmem:[#allocation13 + $0x510] sm:$0xff]  ;;  %v1417_v46 = vld [vmem:[#allocation13 + $0x518] sm:$0xff] }
 0x489   :  { %3092 = vmatprep.subr.bf16.mxu0 %v4381_v57  ;;  %v4435_v57 = vcombine.high %v1368_v51, %v1372_v52  ;;  %v1420_v44 = vld [vmem:[#allocation13 + $0x530] sm:$0xff]  ;;  %v1421_v47 = vld [vmem:[#allocation13 + $0x538] sm:$0xff] }
 0x48b   :  { %3011 = vmatpush1.bf16.msra.mxu1 %v4378_v62  ;;  %v1381_v62 = vld [vmem:[#allocation13 + $0x3f8] sm:$0xff] }
 0x48c   :  { %3093 = vmatpush1.bf16.msra.mxu0 %v4380_v63  ;;  %3012 = vmatprep.subr.bf16.mxu1 %v4387_v0  ;;  %v4434_v63 = vcombine.low %v1368_v51, %v1372_v52  ;;  %v4436_v0 = vcombine.low %v1369_v53, %v1373_v54  ;;  %v4445_v2 = vcombine.high %v1377_v60, %v1381_v62  ;;  %v1428_v51 = vld [vmem:[#allocation13 + $0x570] sm:$0xff]  ;;  %v1425_v52 = vld [vmem:[#allocation13 + $0x558] sm:$0xff] }
 0x48d   :  { %3094 = vmatprep.subr.bf16.mxu0 %v4389_v1  ;;  %v4443_v1 = vcombine.high %v1376_v20, %v1380_v59  ;;  %v1429_v53 = vld [vmem:[#allocation13 + $0x578] sm:$0xff]  ;;  %v4482_v54 = vcombine.low %v1416_v43, %v1420_v44 }
 0x48f   :  { %3013 = vmatpush1.bf16.msra.mxu1 %v4386_v10  ;;  %v1389_v10 = vld [vmem:[#allocation13 + $0x438] sm:$0xff] }
 0x490   :  { %3095 = vmatpush1.bf16.msra.mxu0 %v4388_v11  ;;  %3014 = vmatprep.subr.bf16.mxu1 %v4395_v12  ;;  %v4442_v11 = vcombine.low %v1376_v20, %v1380_v59  ;;  %v4444_v12 = vcombine.low %v1377_v60, %v1381_v62  ;;  %v4453_v15 = vcombine.high %v1385_v9, %v1389_v10  ;;  %v1436_v20 = vld [vmem:[#allocation13 + $0x5b0] sm:$0xff]  ;;  %v1433_v59 = vld [vmem:[#allocation13 + $0x598] sm:$0xff] }
 0x491   :  { %3096 = vmatprep.subr.bf16.mxu0 %v4397_v13  ;;  %v4451_v13 = vcombine.high %v1384_v6, %v1388_v8  ;;  %v1437_v60 = vld [vmem:[#allocation13 + $0x5b8] sm:$0xff]  ;;  %v1444_v6 = vld [vmem:[#allocation13 + $0x5f0] sm:$0xff] }
 0x492   :  { %v1441_v8 = vld [vmem:[#allocation13 + $0x5d8] sm:$0xff] }
 0x493   :  { %3015 = vmatpush1.bf16.msra.mxu1 %v4394_v21  ;;  %v1393_v21 = vld [vmem:[#allocation13 + $0x458] sm:$0xff] }
 0x494   :  { %3097 = vmatpush1.bf16.msra.mxu0 %v4396_v22  ;;  %3016 = vmatprep.subr.bf16.mxu1 %v4403_v23  ;;  %v1397_v22 = vld [vmem:[#allocation13 + $0x478] sm:$0xff]  ;;  %v4452_v23 = vcombine.low %v1385_v9, %v1389_v10 }
 0x495   :  { %3098 = vmatprep.subr.bf16.mxu0 %v4405_v24  ;;  %v4459_v24 = vcombine.high %v1392_v17, %v1396_v18  ;;  %v4461_v27 = vcombine.high %v1393_v21, %v1397_v22  ;;  %v1445_v9 = vld [vmem:[#allocation13 + $0x5f8] sm:$0xff] }
 0x497   :  { %3017 = vmatpush1.bf16.msra.mxu1 %v4402_v29  ;;  %v1405_v29 = vld [vmem:[#allocation13 + $0x4b8] sm:$0xff] }
 0x498   :  { %3099 = vmatpush1.bf16.msra.mxu0 %v4404_v30  ;;  %3018 = vmatprep.subr.bf16.mxu1 %v4411_v31  ;;  %v4458_v30 = vcombine.low %v1392_v17, %v1396_v18  ;;  %v4460_v31 = vcombine.low %v1393_v21, %v1397_v22  ;;  %v4469_v33 = vcombine.high %v1401_v28, %v1405_v29  ;;  %v1452_v17 = vld [vmem:[#allocation13 + $0x630] sm:$0xff]  ;;  %v1449_v18 = vld [vmem:[#allocation13 + $0x618] sm:$0xff] }
 0x499   :  { %3100 = vmatprep.subr.bf16.mxu0 %v4413_v32  ;;  %v4467_v32 = vcombine.high %v1400_v26, %v1404_v37  ;;  %v4508_v22 = vcombine.low %v1441_v8, %v1445_v9 }
 0x49b   :  { %3019 = vmatpush1.bf16.msra.mxu1 %v4410_v39  ;;  %v1413_v39 = vld [vmem:[#allocation13 + $0x4f8] sm:$0xff] }
 0x49c   :  { %3101 = vmatpush1.bf16.msra.mxu0 %v4412_v40  ;;  %3020 = vmatprep.subr.bf16.mxu1 %v4419_v41  ;;  %v4466_v40 = vcombine.low %v1400_v26, %v1404_v37  ;;  %v4475_v41 = vcombine.high %v1408_v34, %v1412_v35  ;;  %v1456_v26 = vld [vmem:[#allocation13 + $0x650] sm:$0xff] }
 0x49d   :  { %3102 = vmatprep.subr.bf16.mxu0 %v4421_v42  ;;  %v4477_v42 = vcombine.high %v1409_v36, %v1413_v39  ;;  %v1460_v37 = vld [vmem:[#allocation13 + $0x670] sm:$0xff] }
 0x49f   :  { %3021 = vmatpush1.bf16.msra.mxu1 %v4418_v48  ;;  %v4476_v48 = vcombine.low %v1409_v36, %v1413_v39  ;;  %v1469_v36 = vld [vmem:[#allocation13 + $0x6b8] sm:$0xff]  ;;  %v4522_v39 = vcombine.low %v1456_v26, %v1460_v37 }
 0x4a0   :  { %3103 = vmatpush1.bf16.msra.mxu0 %v4420_v49  ;;  %3022 = vmatprep.subr.bf16.mxu1 %v4427_v14  ;;  %v4483_v49 = vcombine.high %v1416_v43, %v1420_v44  ;;  %v4485_v14 = vcombine.high %v1417_v46, %v1421_v47  ;;  %v1476_v43 = vld [vmem:[#allocation13 + $0x6f0] sm:$0xff]  ;;  %v1473_v44 = vld [vmem:[#allocation13 + $0x6d8] sm:$0xff] }
 0x4a1   :  { %3104 = vmatprep.subr.bf16.mxu0 %v4429_v50  ;;  %v1424_v50 = vld [vmem:[#allocation13 + $0x550] sm:$0xff] }
 0x4a2   :  { %v4490_v62 = vcombine.low %v1424_v50, %v1428_v51 }
 0x4a3   :  { %3023 = vmatpush1.bf16.msra.mxu1 %v4426_v55  ;;  %v4484_v55 = vcombine.low %v1417_v46, %v1421_v47  ;;  %v1477_v46 = vld [vmem:[#allocation13 + $0x6f8] sm:$0xff] }
 0x4a4   :  { %3105 = vmatpush1.bf16.msra.mxu0 %v4428_v56  ;;  %3024 = vmatprep.subr.bf16.mxu1 %v4435_v57  ;;  %v4491_v56 = vcombine.high %v1424_v50, %v1428_v51  ;;  %v4493_v57 = vcombine.high %v1425_v52, %v1429_v53  ;;  %v1484_v50 = vld [vmem:[#allocation13 + $0x730] sm:$0xff]  ;;  %v1481_v51 = vld [vmem:[#allocation13 + $0x718] sm:$0xff] }
 0x4a5   :  { %3106 = vmatprep.subr.bf16.mxu0 %v4437_v58  ;;  %v1432_v58 = vld [vmem:[#allocation13 + $0x590] sm:$0xff] }
 0x4a6   :  { %v4498_v10 = vcombine.low %v1432_v58, %v1436_v20 }
 0x4a7   :  { %3025 = vmatpush1.bf16.msra.mxu1 %v4434_v63  ;;  %v4492_v63 = vcombine.low %v1425_v52, %v1429_v53  ;;  %v1485_v52 = vld [vmem:[#allocation13 + $0x738] sm:$0xff] }
 0x4a8   :  { %3107 = vmatpush1.bf16.msra.mxu0 %v4436_v0  ;;  %3026 = vmatprep.subr.bf16.mxu1 %v4443_v1  ;;  %v4499_v0 = vcombine.high %v1432_v58, %v1436_v20  ;;  %v4501_v1 = vcombine.high %v1433_v59, %v1437_v60  ;;  %v1492_v58 = vld [vmem:[#allocation13 + $0x770] sm:$0xff]  ;;  %v1489_v20 = vld [vmem:[#allocation13 + $0x758] sm:$0xff] }
 0x4a9   :  { %3108 = vmatprep.subr.bf16.mxu0 %v4445_v2  ;;  %v1440_v2 = vld [vmem:[#allocation13 + $0x5d0] sm:$0xff] }
 0x4aa   :  { %v4506_v21 = vcombine.low %v1440_v2, %v1444_v6 }
 0x4ab   :  { %3027 = vmatpush1.bf16.msra.mxu1 %v4442_v11  ;;  %v4500_v11 = vcombine.low %v1433_v59, %v1437_v60  ;;  %v1493_v59 = vld [vmem:[#allocation13 + $0x778] sm:$0xff] }
 0x4ac   :  { %3109 = vmatpush1.bf16.msra.mxu0 %v4444_v12  ;;  %3037 = vmatprep.subr.bf16.mxu1 %v4451_v13  ;;  %v4507_v12 = vcombine.high %v1440_v2, %v1444_v6  ;;  %v4509_v13 = vcombine.high %v1441_v8, %v1445_v9  ;;  %v1500_v2 = vld [vmem:[#allocation13 + $0x7b0] sm:$0xff]  ;;  %v1497_v6 = vld [vmem:[#allocation13 + $0x798] sm:$0xff] }
 0x4ad   :  { %3119 = vmatprep.subr.bf16.mxu0 %v4453_v15  ;;  %v1448_v15 = vld [vmem:[#allocation13 + $0x610] sm:$0xff]  ;;  %v1501_v8 = vld [vmem:[#allocation13 + $0x7b8] sm:$0xff] }
 0x4ae   :  { %3029 = vmatmul.mubr.bf16.vlgmr.msra.gmra.mrb[12].mxu1 %v5740_v38 }
 0x4af   :  { %3111 = vmatmul.mubr.bf16.vlgmr.msra.gmra.mrb[16].mxu0 %v5740_v38  ;;  %3038 = vmatpush1.bf16.msra.mxu1 %v4450_v19  ;;  %v4468_v38 = vcombine.low %v1401_v28, %v1405_v29  ;;  %v1453_v19 = vld [vmem:[#allocation13 + $0x638] sm:$0xff]  ;;  %v4514_v29 = vcombine.low %v1448_v15, %v1452_v17 }
 0x4b0   :  { %3069 = vmatprep.mubr.bf16.mxu1 %v5744_v45  ;;  %3120 = vmatpush1.bf16.msra.mxu0 %v4452_v23  ;;  %v4515_v23 = vcombine.high %v1448_v15, %v1452_v17  ;;  %v1461_v28 = vld [vmem:[#allocation13 + $0x678] sm:$0xff]  ;;  %v1508_v15 = vld [vmem:[#allocation13 + $0x7f0] sm:$0xff] }
 0x4b1   :  { %3151 = vmatprep.mubr.bf16.mxu0 %v5744_v45  ;;  %3039 = vmatprep.subr.bf16.mxu1 %v4459_v24  ;;  %v4474_v45 = vcombine.low %v1408_v34, %v1412_v35  ;;  %v4517_v24 = vcombine.high %v1449_v18, %v1453_v19  ;;  %v1468_v34 = vld [vmem:[#allocation13 + $0x6b0] sm:$0xff]  ;;  %v1465_v35 = vld [vmem:[#allocation13 + $0x698] sm:$0xff] }
 0x4b2   :  { %3121 = vmatprep.subr.bf16.mxu0 %v4461_v27  ;;  %v1457_v27 = vld [vmem:[#allocation13 + $0x658] sm:$0xff] }
 0x4b3   :  { %3040 = vmatpush1.bf16.msra.mxu1 %v4458_v30  ;;  %v4516_v30 = vcombine.low %v1449_v18, %v1453_v19  ;;  %v1505_v17 = vld [vmem:[#allocation13 + $0x7d8] sm:$0xff] }
 0x4b4   :  { %3122 = vmatpush1.bf16.msra.mxu0 %v4460_v31  ;;  %3041 = vmatprep.subr.bf16.mxu1 %v4467_v32  ;;  %v4523_v31 = vcombine.high %v1456_v26, %v1460_v37  ;;  %v4525_v32 = vcombine.high %v1457_v27, %v1461_v28  ;;  %v1509_v18 = vld [vmem:[#allocation13 + $0x7f8] sm:$0xff]  ;;  %v5100_v37 = vld [vmem:[#allocation14 + $0x40] sm:$0xff]  }
 0x4b5   :  { %3123 = vmatprep.subr.bf16.mxu0 %v4469_v33  ;;  %v1464_v33 = vld [vmem:[#allocation13 + $0x690] sm:$0xff]  ;;  %v4572_v26 = vcombine.low %v1505_v17, %v1509_v18 }
 0x4b6   :  { %v4530_v47 = vcombine.low %v1464_v33, %v1468_v34 }
 0x4b7   :  { %3042 = vmatpush1.bf16.msra.mxu1 %v4466_v40  ;;  %v4524_v40 = vcombine.low %v1457_v27, %v1461_v28  ;;  %v5101_v27 = vld [vmem:[#allocation14 + $0xc0] sm:$0xff]  }
 0x4b8   :  { %3124 = vmatpush1.bf16.msra.mxu0 %v4468_v38  ;;  %3043 = vmatprep.subr.bf16.mxu1 %v4475_v41  ;;  %v4531_v38 = vcombine.high %v1464_v33, %v1468_v34  ;;  %v4533_v41 = vcombine.high %v1465_v35, %v1469_v36  ;;  %v5102_v28 = vld [vmem:[#allocation14] sm:$0xff]   ;;  %v5107_v33 = vld [vmem:[#allocation14 + $0x88] sm:$0xff]   ;;  %v5108_v34 = vld [vmem:[#allocation14 + $0x50] sm:$0xff]  }
 0x4b9   :  { %3125 = vmatprep.subr.bf16.mxu0 %v4477_v42  ;;  %v1472_v42 = vld [vmem:[#allocation13 + $0x6d0] sm:$0xff] }
 0x4ba   :  { %v4538_v53 = vcombine.low %v1472_v42, %v1476_v43 }
 0x4bb   :  { %3044 = vmatpush1.bf16.msra.mxu1 %v4474_v45  ;;  %v4532_v45 = vcombine.low %v1465_v35, %v1469_v36  ;;  %v5109_v35 = vld [vmem:[#allocation14 + $0xd0] sm:$0xff]  }
 0x4bc   :  { %3126 = vmatpush1.bf16.msra.mxu0 %v4476_v48  ;;  %3045 = vmatprep.subr.bf16.mxu1 %v4483_v49  ;;  %v4539_v48 = vcombine.high %v1472_v42, %v1476_v43  ;;  %v4541_v49 = vcombine.high %v1473_v44, %v1477_v46  ;;  %v5110_v36 = vld [vmem:[#allocation14 + $0x10] sm:$0xff]   ;;  %v5116_v42 = vld [vmem:[#allocation14 + $0x60] sm:$0xff]  }
 0x4bd   :  { %3127 = vmatprep.subr.bf16.mxu0 %v4485_v14  ;;  %v1480_v14 = vld [vmem:[#allocation13 + $0x710] sm:$0xff]  ;;  %v5117_v43 = vld [vmem:[#allocation14 + $0xe0] sm:$0xff]  }
 0x4be   :  { %v4546_v60 = vcombine.low %v1480_v14, %v1484_v50 }
 0x4bf   :  { %3046 = vmatpush1.bf16.msra.mxu1 %v4482_v54  ;;  %v4540_v54 = vcombine.low %v1473_v44, %v1477_v46  ;;  %v5118_v44 = vld [vmem:[#allocation14 + $0x20] sm:$0xff]  }
 0x4c0   :  { %3128 = vmatpush1.bf16.msra.mxu0 %v4484_v55  ;;  %3047 = vmatprep.subr.bf16.mxu1 %v4491_v56  ;;  %v4547_v55 = vcombine.high %v1480_v14, %v1484_v50  ;;  %v4549_v56 = vcombine.high %v1481_v51, %v1485_v52  ;;  %v5119_v46 = vld [vmem:[#allocation14 + $0xa0] sm:$0xff]   ;;  %v5124_v14 = vld [vmem:[#allocation14 + $0x70] sm:$0xff]  }
 0x4c1   :  { %3129 = vmatprep.subr.bf16.mxu0 %v4493_v57  ;;  %v1488_v57 = vld [vmem:[#allocation13 + $0x750] sm:$0xff] }
 0x4c2   :  { %v4554_v9 = vcombine.low %v1488_v57, %v1492_v58  ;;  %v5125_v50 = vld [vmem:[#allocation14 + $0xf0] sm:$0xff]  }
 0x4c3   :  { %3048 = vmatpush1.bf16.msra.mxu1 %v4490_v62  ;;  %v4548_v62 = vcombine.low %v1481_v51, %v1485_v52  ;;  %v5126_v51 = vld [vmem:[#allocation14 + $0x30] sm:$0xff]  }
 0x4c4   :  { %3130 = vmatpush1.bf16.msra.mxu0 %v4492_v63  ;;  %3049 = vmatprep.subr.bf16.mxu1 %v4499_v0  ;;  %v4555_v63 = vcombine.high %v1488_v57, %v1492_v58  ;;  %v4557_v0 = vcombine.high %v1489_v20, %v1493_v59  ;;  %v5127_v52 = vld [vmem:[#allocation14 + $0xb0] sm:$0xff]   ;;  %v5132_v57 = vld [vmem:[#allocation14 + $0x140] sm:$0xff]  }
 0x4c5   :  { %3131 = vmatprep.subr.bf16.mxu0 %v4501_v1  ;;  %v1496_v1 = vld [vmem:[#allocation13 + $0x790] sm:$0xff]  ;;  %v5133_v58 = vld [vmem:[#allocation14 + $0x1c0] sm:$0xff]  }
 0x4c6   :  { %v4562_v19 = vcombine.low %v1496_v1, %v1500_v2 }
 0x4c7   :  { %3050 = vmatpush1.bf16.msra.mxu1 %v4498_v10  ;;  %v4556_v10 = vcombine.low %v1489_v20, %v1493_v59  ;;  %v5770_v20 = vld [vmem:[%s5881_s10] sm:$0xff] }
 0x4c8   :  { %3132 = vmatpush1.bf16.msra.mxu0 %v4500_v11  ;;  %3051 = vmatprep.subr.bf16.mxu1 %v4507_v12  ;;  %v4563_v11 = vcombine.high %v1496_v1, %v1500_v2  ;;  %v4565_v12 = vcombine.high %v1497_v6, %v1501_v8  ;;  %v1515_v59 = vrot.slane %v5770_v20, %v5696_v5 }
 0x4c9   :  { %3133 = vmatprep.subr.bf16.mxu0 %v4509_v13  ;;  %v1504_v13 = vld [vmem:[#allocation13 + $0x7d0] sm:$0xff] }
 0x4cb   :  { %3052 = vmatpush1.bf16.msra.mxu1 %v4506_v21  ;;  %v4564_v21 = vcombine.low %v1497_v6, %v1501_v8 }
 0x4cc   :  { %3134 = vmatpush1.bf16.msra.mxu0 %v4508_v22  ;;  %3053 = vmatprep.subr.bf16.mxu1 %v4515_v23  ;;  %v4571_v22 = vcombine.high %v1504_v13, %v1508_v15  ;;  %v4573_v23 = vcombine.high %v1505_v17, %v1509_v18 }
 0x4cd   :  { %3135 = vmatprep.subr.bf16.mxu0 %v4517_v24  ;;  %v4570_v24 = vcombine.low %v1504_v13, %v1508_v15 }
 0x4cf   :  { %3054 = vmatpush1.bf16.msra.mxu1 %v4514_v29  ;;  %v5103_v29 = vld [vmem:[#allocation14 + $0x80] sm:$0xff]  }
 0x4d0   :  { %3136 = vmatpush1.bf16.msra.mxu0 %v4516_v30  ;;  %3055 = vmatprep.subr.bf16.mxu1 %v4523_v31  ;;  %v5104_v30 = vld [vmem:[#allocation14 + $0x48] sm:$0xff]  }
 0x4d1   :  { %3137 = vmatprep.subr.bf16.mxu0 %v4525_v32  ;;  %v5105_v31 = vld [vmem:[#allocation14 + $0xc8] sm:$0xff]  }
 0x4d2   :  { %v5106_v32 = vld [vmem:[#allocation14 + $0x8] sm:$0xff]  }
 0x4d3   :  { %3056 = vmatpush1.bf16.msra.mxu1 %v4522_v39  ;;  %v5111_v39 = vld [vmem:[#allocation14 + $0x90] sm:$0xff]  }
 0x4d4   :  { %3138 = vmatpush1.bf16.msra.mxu0 %v4524_v40  ;;  %3057 = vmatprep.subr.bf16.mxu1 %v4531_v38  ;;  %v5112_v40 = vld [vmem:[#allocation14 + $0x58] sm:$0xff]  }
 0x4d5   :  { %3139 = vmatprep.subr.bf16.mxu0 %v4533_v41  ;;  %v5113_v38 = vld [vmem:[#allocation14 + $0xd8] sm:$0xff]  }
 0x4d6   :  { %v5114_v41 = vld [vmem:[#allocation14 + $0x18] sm:$0xff]  }
 0x4d7   :  { %3058 = vmatpush1.bf16.msra.mxu1 %v4530_v47  ;;  %v5120_v47 = vld [vmem:[#allocation14 + $0x68] sm:$0xff]  }
 0x4d8   :  { %3140 = vmatpush1.bf16.msra.mxu0 %v4532_v45  ;;  %3059 = vmatprep.subr.bf16.mxu1 %v4539_v48  ;;  %v5121_v45 = vld [vmem:[#allocation14 + $0xe8] sm:$0xff]  }
 0x4d9   :  { %3141 = vmatprep.subr.bf16.mxu0 %v4541_v49  ;;  %v5122_v48 = vld [vmem:[#allocation14 + $0x28] sm:$0xff]  }
 0x4da   :  { %v5123_v49 = vld [vmem:[#allocation14 + $0xa8] sm:$0xff]  }
 0x4db   :  { %3060 = vmatpush1.bf16.msra.mxu1 %v4538_v53  ;;  %v5128_v53 = vld [vmem:[#allocation14 + $0x78] sm:$0xff]  }
 0x4dc   :  { %3142 = vmatpush1.bf16.msra.mxu0 %v4540_v54  ;;  %3061 = vmatprep.subr.bf16.mxu1 %v4547_v55  ;;  %v5129_v54 = vld [vmem:[#allocation14 + $0xf8] sm:$0xff]  }
 0x4dd   :  { %3143 = vmatprep.subr.bf16.mxu0 %v4549_v56  ;;  %v5130_v55 = vld [vmem:[#allocation14 + $0x38] sm:$0xff]  }
 0x4de   :  { %v5131_v56 = vld [vmem:[#allocation14 + $0xb8] sm:$0xff]  }
 0x4df   :  { %3062 = vmatpush1.bf16.msra.mxu1 %v4546_v60  ;;  %v1523_v60 = vrot.slane %v5770_v20, %v834_v25 }
 0x4e0   :  { %3144 = vmatpush1.bf16.msra.mxu0 %v4548_v62  ;;  %3063 = vmatprep.subr.bf16.mxu1 %v4555_v63  ;;  %v1519_v62 = vrot.slane %v5770_v20, %v5702_v7  ;;  %v1527_v63 = vrot.slane %v5770_v20, %v838_v16  ;;  %v5135_v16 = vld [vmem:[#allocation14 + $0x180] sm:$0xff]  }
 0x4e1   :  { %3145 = vmatprep.subr.bf16.mxu0 %v4557_v0 }
 0x4e3   :  { %3064 = vmatpush1.bf16.msra.mxu1 %v4554_v9 }
 0x4e4   :  { %3146 = vmatpush1.bf16.msra.mxu0 %v4556_v10  ;;  %3065 = vmatprep.subr.bf16.mxu1 %v4563_v11 }
 0x4e5   :  { %3147 = vmatprep.subr.bf16.mxu0 %v4565_v12 }
 0x4e7   :  { %3066 = vmatpush1.bf16.msra.mxu1 %v4562_v19 }
 0x4e8   :  { %3148 = vmatpush1.bf16.msra.mxu0 %v4564_v21  ;;  %3067 = vmatprep.subr.bf16.mxu1 %v4571_v22  ;;  %v5134_v22 = vld [vmem:[#allocation14 + $0x100] sm:$0xff]  }
 0x4e9   :  { %3149 = vmatprep.subr.bf16.mxu0 %v4573_v23 }
 0x4eb   :  { %3068 = vmatpush1.bf16.msra.mxu1 %v4570_v24 }
 0x4ec   :  { %3150 = vmatpush1.bf16.msra.mxu0 %v4572_v26  ;;  %4656 = vmatprep.subr.bf16.mxu1 %v5100_v37  ;;  %v5136_v26 = vld [vmem:[#allocation14 + $0x148] sm:$0xff]  }
 0x4ed   :  { %4678 = vmatprep.subr.bf16.mxu0 %v5101_v27  ;;  %v5137_v37 = vld [vmem:[#allocation14 + $0x1c8] sm:$0xff]  }
 0x4ee   :  { %3070 = vmatmul.mubr.bf16.vlgmr.msra.gmra.mrb[12].mxu1 %v5755_v61  ;;  %v5138_v27 = vld [vmem:[#allocation14 + $0x108] sm:$0xff]  }
 0x4ef   :  { %3152 = vmatmul.mubr.bf16.vlgmr.msra.gmra.mrb[16].mxu0 %v5755_v61  ;;  %4657 = vmatpush3.bf16.msra.mxu1 %v5102_v28  ;;  %v5115_v61 = vld [vmem:[#allocation14 + $0x98] sm:$0xff]   ;;  %v5139_v28 = vld [vmem:[#allocation14 + $0x188] sm:$0xff]  }
 0x4f0   :  { %4679 = vmatpush3.bf16.msra.mxu0 %v5103_v29  ;;  %4658 = vmatprep.subr.bf16.mxu1 %v5104_v30  ;;  %v5140_v29 = vld [vmem:[#allocation14 + $0x150] sm:$0xff]  }
 0x4f1   :  { %4680 = vmatprep.subr.bf16.mxu0 %v5105_v31  ;;  %v5141_v30 = vld [vmem:[#allocation14 + $0x1d0] sm:$0xff]  }
 0x4f2   :  { %v5142_v31 = vld [vmem:[#allocation14 + $0x110] sm:$0xff]  }
 0x4f3   :  { %4659 = vmatpush3.bf16.msra.mxu1 %v5106_v32  ;;  %v5143_v32 = vld [vmem:[#allocation14 + $0x190] sm:$0xff]  }
 0x4f4   :  { %4681 = vmatpush3.bf16.msra.mxu0 %v5107_v33  ;;  %4660 = vmatprep.subr.bf16.mxu1 %v5108_v34  ;;  %v5144_v33 = vld [vmem:[#allocation14 + $0x158] sm:$0xff]  }
 0x4f5   :  { %4682 = vmatprep.subr.bf16.mxu0 %v5109_v35  ;;  %v5145_v34 = vld [vmem:[#allocation14 + $0x1d8] sm:$0xff]  }
 0x4f6   :  { %v5146_v35 = vld [vmem:[#allocation14 + $0x118] sm:$0xff]  }
 0x4f7   :  { %4661 = vmatpush3.bf16.msra.mxu1 %v5110_v36  ;;  %v5147_v36 = vld [vmem:[#allocation14 + $0x198] sm:$0xff]  }
 0x4f8   :  { %4683 = vmatpush3.bf16.msra.mxu0 %v5111_v39  ;;  %4662 = vmatprep.subr.bf16.mxu1 %v5112_v40  ;;  %v5148_v39 = vld [vmem:[#allocation14 + $0x160] sm:$0xff]  }
 0x4f9   :  { %4684 = vmatprep.subr.bf16.mxu0 %v5113_v38  ;;  %v5149_v40 = vld [vmem:[#allocation14 + $0x1e0] sm:$0xff]  }
 0x4fa   :  { %v5150_v38 = vld [vmem:[#allocation14 + $0x120] sm:$0xff]  }
 0x4fb   :  { %4663 = vmatpush3.bf16.msra.mxu1 %v5114_v41  ;;  %v5151_v41 = vld [vmem:[#allocation14 + $0x1a0] sm:$0xff]  }
 0x4fc   :  { %4685 = vmatpush3.bf16.msra.mxu0 %v5115_v61  ;;  %4664 = vmatprep.subr.bf16.mxu1 %v5116_v42  ;;  %v5152_v61 = vld [vmem:[#allocation14 + $0x168] sm:$0xff]  }
 0x4fd   :  { %4686 = vmatprep.subr.bf16.mxu0 %v5117_v43  ;;  %v5153_v42 = vld [vmem:[#allocation14 + $0x1e8] sm:$0xff]  }
 0x4fe   :  { %v5154_v43 = vld [vmem:[#allocation14 + $0x128] sm:$0xff]  }
 0x4ff   :  { %4665 = vmatpush3.bf16.msra.mxu1 %v5118_v44  ;;  %v5155_v44 = vld [vmem:[#allocation14 + $0x1a8] sm:$0xff]  }
 0x500   :  { %4687 = vmatpush3.bf16.msra.mxu0 %v5119_v46  ;;  %4666 = vmatprep.subr.bf16.mxu1 %v5120_v47  ;;  %v5156_v46 = vld [vmem:[#allocation14 + $0x170] sm:$0xff]  }
 0x501   :  { %4688 = vmatprep.subr.bf16.mxu0 %v5121_v45  ;;  %v5157_v47 = vld [vmem:[#allocation14 + $0x1f0] sm:$0xff]  }
 0x502   :  { %v5158_v45 = vld [vmem:[#allocation14 + $0x130] sm:$0xff]  }
 0x503   :  { %4667 = vmatpush3.bf16.msra.mxu1 %v5122_v48  ;;  %v5159_v48 = vld [vmem:[#allocation14 + $0x1b0] sm:$0xff]  }
 0x504   :  { %4689 = vmatpush3.bf16.msra.mxu0 %v5123_v49  ;;  %4668 = vmatprep.subr.bf16.mxu1 %v5124_v14  ;;  %v5160_v49 = vld [vmem:[#allocation14 + $0x178] sm:$0xff]  }
 0x505   :  { %4690 = vmatprep.subr.bf16.mxu0 %v5125_v50  ;;  %v5161_v14 = vld [vmem:[#allocation14 + $0x1f8] sm:$0xff]  }
 0x506   :  { %v5162_v50 = vld [vmem:[#allocation14 + $0x138] sm:$0xff]  }
 0x507   :  { %4669 = vmatpush3.bf16.msra.mxu1 %v5126_v51  ;;  %v5163_v51 = vld [vmem:[#allocation14 + $0x1b8] sm:$0xff]  }
 0x508   :  { %4691 = vmatpush3.bf16.msra.mxu0 %v5127_v52  ;;  %4670 = vmatprep.subr.bf16.mxu1 %v5128_v53  ;;  %v5459_v52 = vmov 0.0   ;;  %v1530_v53 = vsub.s32 4, %v5693_v4 }
 0x509   :  { %4692 = vmatprep.subr.bf16.mxu0 %v5129_v54  ;;  %v1538_v54 = vsub.s32 6, %v5693_v4 }
 0x50b   :  { %4671 = vmatpush3.bf16.msra.mxu1 %v5130_v55  ;;  %v1534_v55 = vsub.s32 5, %v5693_v4 }
 0x50c   :  { %4693 = vmatpush3.bf16.msra.mxu0 %v5131_v56  ;;  %4700 = vmatprep.subr.bf16.mxu1 %v5132_v57  ;;  %v1542_v56 = vsub.s32 7, %v5693_v4  ;;  %v1531_v57 = vrot.slane %v5770_v20, %v1530_v53 }
 0x50d   :  { %4722 = vmatprep.subr.bf16.mxu0 %v5133_v58  ;;  %v1539_v58 = vrot.slane %v5770_v20, %v1538_v54 }
 0x541   :  { %v2907_v0 = vpop.f32.mrb[8].mxu1  ;;  %v2989_v1 = vpop.f32.mrb[12].mxu0 }
 0x542   :  { %v4860_v2 = vadd.f32 %v2907_v0, %v1515_v59  ;;  %v4862_v6 = vadd.f32 %v2989_v1, %v1523_v60  ;;  %v2909_v8 = vpop.f32.mrb[9].mxu1  ;;  %v2991_v9 = vpop.f32.mrb[13].mxu0  ;;  %v1535_v59 = vrot.slane %v5770_v20, %v1534_v55  ;;  %v1543_v60 = vrot.slane %v5770_v20, %v1542_v56 }
 0x543   :  { %v4861_v10 = vadd.f32 %v2909_v8, %v1519_v62  ;;  %v4863_v11 = vadd.f32 %v2991_v9, %v1527_v63  ;;  %v2911_v5 = vpop.f32.mrb[10].mxu1  ;;  %v2993_v12 = vpop.f32.mrb[14].mxu0 }
 0x544   :  { %v3160_v13 = vmax.f32 %v4860_v2, 0.0  ;;  %v3162_v15 = vmax.f32 %v4862_v6, 0.0  ;;  %v2912_v25 = vpop.f32.mrb[11].mxu1  ;;  %v2994_v17 = vpop.f32.mrb[15].mxu0 }
 0x545   :  { %v3161_v18 = vmax.f32 %v4861_v10, 0.0  ;;  %v3163_v7 = vmax.f32 %v4863_v11, 0.0 }
 0x546   :  { %v3168_v23 = vpack.c.bf16 %v3160_v13, %v3160_v13  ;;  %v3170_v24 = vpack.c.bf16 %v3162_v15, %v3162_v15 }
 0x547   :  { %v3169_v19 = vpack.c.bf16 %v3161_v18, %v3161_v18  ;;  %v3171_v21 = vpack.c.bf16 %v3163_v7, %v3163_v7  ;;  %v5792_v18 = vld [vmem:[#allocation16] sm:$0xff]  }
 0x549   :  { %3727 = vmatprep.mubr.bf16.mxu1 %v3169_v19  ;;  %3767 = vmatprep.mubr.bf16.mxu0 %v3171_v21  ;;  %v5795_v21 = vld [vmem:[#allocation16 + $0x8] sm:$0xff]  }
 0x54a   :  { %3728 = vmatmul.mubr.bf16.vlgmr.msra.gmra.mrb[16].mxu1 %v3168_v23  ;;  %3768 = vmatmul.mubr.bf16.vlgmr.msra.gmra.mrb[20].mxu0 %v3170_v24  ;;  %v5807_v23 = vld [vmem:[#allocation16 + $0x20] sm:$0xff]   ;;  %v5811_v24 = vld [vmem:[#allocation16 + $0x28] sm:$0xff]  }
 0x54b   :  { %4701 = vmatpush3.bf16.msra.mxu1 %v5134_v22  ;;  %4723 = vmatpush3.bf16.msra.mxu0 %v5135_v16  ;;  %v5799_v22 = vld [vmem:[#allocation16 + $0x10] sm:$0xff]   ;;  %v5803_v16 = vld [vmem:[#allocation16 + $0x18] sm:$0xff]  }
 0x54c   :  { %4702 = vmatprep.subr.bf16.mxu1 %v5136_v26  ;;  %4724 = vmatprep.subr.bf16.mxu0 %v5137_v37 }
 0x54f   :  { %4703 = vmatpush3.bf16.msra.mxu1 %v5138_v27  ;;  %4725 = vmatpush3.bf16.msra.mxu0 %v5139_v28  ;;  %v4574_v27 = vld [vmem:[%s5883_s12] ss:$0 sm:$0xff]  ;;  %s5461_s12 = smov [#allocation19]  }
 0x550   :  { %4704 = vmatprep.subr.bf16.mxu1 %v5140_v29  ;;  %4726 = vmatprep.subr.bf16.mxu0 %v5141_v30  ;;  %s4172_s25 = sshll.u32 %s5461_s12, 4  ;;  %s4173_s25 = int_to_ptr.vmem [resolvable:$true] %s4172_s25 }
 0x551   :  { %s5404_s19 = scalar_lea.vmem %s4173_s25, 128  ;;  %p5409_p11 = scmp.lt.s32.totalorder %s4173_s25, %s4173_s25 }
 0x552   :  { %p5405_p10 = scmp.ne.s32.totalorder %s4173_s25, %s5404_s19  ;;  %p5410_p12 = scmp.lt.s32.totalorder %s5404_s19, %s5404_s19 }
 0x553   :  { %4705 = vmatpush3.bf16.msra.mxu1 %v5142_v31  ;;  %4727 = vmatpush3.bf16.msra.mxu0 %v5143_v32 }
 0x554   :  { %4706 = vmatprep.subr.bf16.mxu1 %v5144_v33  ;;  %4728 = vmatprep.subr.bf16.mxu0 %v5145_v34  ;;  %p5411_p13 = por %p5410_p12, %p5409_p11 }
 0x556   :  { %p5412_p0 = pnand %p5411_p13, %p5405_p10 }
 0x557   :  { %4707 = vmatpush3.bf16.msra.mxu1 %v5146_v35  ;;  %4729 = vmatpush3.bf16.msra.mxu0 %v5147_v36  ;;  %v5170_v36 = vld [vmem:[#allocation16 + $0x30] sm:$0xff]  }
 0x558   :  { %4708 = vmatprep.subr.bf16.mxu1 %v5148_v39  ;;  %4730 = vmatprep.subr.bf16.mxu0 %v5149_v40 }
 0x55b   :  { %4709 = vmatpush3.bf16.msra.mxu1 %v5150_v38  ;;  %4731 = vmatpush3.bf16.msra.mxu0 %v5151_v41  ;;  %v5171_v38 = vld [vmem:[#allocation16 + $0x38] sm:$0xff]   ;;  %v5172_v41 = vld [vmem:[#allocation17] sm:$0xff]  }
 0x55c   :  { %4710 = vmatprep.subr.bf16.mxu1 %v5152_v61  ;;  %4732 = vmatprep.subr.bf16.mxu0 %v5153_v42  ;;  %v5173_v61 = vld [vmem:[#allocation17 + $0x8] sm:$0xff]   ;;  %v5174_v42 = vld [vmem:[#allocation17 + $0x10] sm:$0xff]  }
 0x55f   :  { %4711 = vmatpush3.bf16.msra.mxu1 %v5154_v43  ;;  %4733 = vmatpush3.bf16.msra.mxu0 %v5155_v44  ;;  %v5175_v43 = vld [vmem:[#allocation17 + $0x18] sm:$0xff]   ;;  %v5176_v44 = vld [vmem:[#allocation17 + $0x20] sm:$0xff]  }
 0x560   :  { %4712 = vmatprep.subr.bf16.mxu1 %v5156_v46  ;;  %4734 = vmatprep.subr.bf16.mxu0 %v5157_v47  ;;  %v5177_v46 = vld [vmem:[#allocation17 + $0x28] sm:$0xff]   ;;  %v5178_v47 = vld [vmem:[#allocation17 + $0x30] sm:$0xff]  }
 0x563   :  { %4713 = vmatpush3.bf16.msra.mxu1 %v5158_v45  ;;  %4735 = vmatpush3.bf16.msra.mxu0 %v5159_v48 }
 0x564   :  { %4714 = vmatprep.subr.bf16.mxu1 %v5160_v49  ;;  %4736 = vmatprep.subr.bf16.mxu0 %v5161_v14 }
 0x567   :  { %4715 = vmatpush3.bf16.msra.mxu1 %v5162_v50  ;;  %4737 = vmatpush3.bf16.msra.mxu0 %v5163_v51 }
 0x568   :  { %4780 = vmatprep.subr.bf16.mxu1 %v5459_v52  ;;  %4800 = vmatprep.subr.bf16.mxu0 %v5459_v52 }
 0x5c1   :  { %v3071_v62 = vpop.f32.mrb[12].mxu1 }
 0x5c2   :  { %v4864_v63 = vadd.f32 %v3071_v62, %v1531_v57  ;;  %v3153_v0 = vpop.f32.mrb[16].mxu0  ;;  %v3073_v1 = vpop.f32.mrb[13].mxu1 }
 0x5c3   :  { %v4866_v2 = vadd.f32 %v3153_v0, %v1539_v58  ;;  %v4865_v6 = vadd.f32 %v3073_v1, %v1535_v59  ;;  %v3155_v8 = vpop.f32.mrb[17].mxu0  ;;  %v3075_v9 = vpop.f32.mrb[14].mxu1 }
 0x5c4   :  { %v3164_v10 = vmax.f32 %v4864_v63, 0.0  ;;  %v4867_v11 = vadd.f32 %v3155_v8, %v1543_v60  ;;  %v3157_v5 = vpop.f32.mrb[18].mxu0  ;;  %v3076_v4 = vpop.f32.mrb[15].mxu1  ;;  %v5179_v60 = vld [vmem:[#allocation17 + $0x38] sm:$0xff]  }
 0x5c5   :  { %v3166_v12 = vmax.f32 %v4866_v2, 0.0  ;;  %v3165_v13 = vmax.f32 %v4865_v6, 0.0  ;;  %v3158_v15 = vpop.f32.mrb[19].mxu0 }
 0x5c6   :  { %v3167_v25 = vmax.f32 %v4867_v11, 0.0  ;;  %v3172_v20 = vpack.c.bf16 %v3164_v10, %v3164_v10 }
 0x5c7   :  { %v3173_v17 = vpack.c.bf16 %v3165_v13, %v3165_v13  ;;  %v3174_v19 = vpack.c.bf16 %v3166_v12, %v3166_v12 }
 0x5c8   :  { %v3175_v7 = vpack.c.bf16 %v3167_v25, %v3167_v25 }
 0x5c9   :  { %3807 = vmatprep.mubr.bf16.mxu1 %v3173_v17 }
 0x5ca   :  { %3847 = vmatprep.mubr.bf16.mxu0 %v3175_v7  ;;  %3808 = vmatmul.mubr.bf16.vlgmr.msra.gmra.mrb[20].mxu1 %v3172_v20 }
 0x5cb   :  { %3848 = vmatmul.mubr.bf16.vlgmr.msra.gmra.mrb[24].mxu0 %v3174_v19  ;;  %4781 = vmatpush3.bf16.msra.mxu1 %v5792_v18 }
 0x5cc   :  { %4782 = vmatprep.subr.bf16.mxu1 %v5459_v52  ;;  %4796 = vmatprep.mubr.msk.bf16.mxu1 %vm5460_vm2, %v5459_v52 }
 0x5cd   :  { %4816 = vmatprep.mubr.msk.bf16.mxu0 %vm5460_vm2, %v5459_v52  ;;  %4801 = vmatpush3.bf16.msra.mxu0 %v5172_v41 }
 0x5ce   :  { %4802 = vmatprep.subr.bf16.mxu0 %v5459_v52 }
 0x5cf   :  { %4783 = vmatpush3.bf16.msra.mxu1 %v5795_v21 }
 0x5d0   :  { %4784 = vmatprep.subr.bf16.mxu1 %v5459_v52 }
 0x5d1   :  { %4803 = vmatpush3.bf16.msra.mxu0 %v5173_v61 }
 0x5d2   :  { %4804 = vmatprep.subr.bf16.mxu0 %v5459_v52 }
 0x5d3   :  { %4785 = vmatpush3.bf16.msra.mxu1 %v5799_v22 }
 0x5d4   :  { %4786 = vmatprep.subr.bf16.mxu1 %v5459_v52 }
 0x5d5   :  { %4805 = vmatpush3.bf16.msra.mxu0 %v5174_v42 }
 0x5d6   :  { %4806 = vmatprep.subr.bf16.mxu0 %v5459_v52 }
 0x5d7   :  { %4787 = vmatpush3.bf16.msra.mxu1 %v5803_v16 }
 0x5d8   :  { %4788 = vmatprep.subr.bf16.mxu1 %v5459_v52 }
 0x5d9   :  { %4807 = vmatpush3.bf16.msra.mxu0 %v5175_v43 }
 0x5da   :  { %4808 = vmatprep.subr.bf16.mxu0 %v5459_v52 }
 0x5db   :  { %4789 = vmatpush3.bf16.msra.mxu1 %v5807_v23 }
 0x5dc   :  { %4790 = vmatprep.subr.bf16.mxu1 %v5459_v52 }
 0x5dd   :  { %4809 = vmatpush3.bf16.msra.mxu0 %v5176_v44 }
 0x5de   :  { %4810 = vmatprep.subr.bf16.mxu0 %v5459_v52 }
 0x5df   :  { %4791 = vmatpush3.bf16.msra.mxu1 %v5811_v24 }
 0x5e0   :  { %4792 = vmatprep.subr.bf16.mxu1 %v5459_v52 }
 0x5e1   :  { %4811 = vmatpush3.bf16.msra.mxu0 %v5177_v46 }
 0x5e2   :  { %4812 = vmatprep.subr.bf16.mxu0 %v5459_v52 }
 0x5e3   :  { %4793 = vmatpush3.bf16.msra.mxu1 %v5170_v36 }
 0x5e4   :  { %4794 = vmatprep.subr.bf16.mxu1 %v5459_v52 }
 0x5e5   :  { %4813 = vmatpush3.bf16.msra.mxu0 %v5178_v47 }
 0x5e6   :  { %4814 = vmatprep.subr.bf16.mxu0 %v5459_v52 }
 0x5e7   :  { %4795 = vmatpush3.bf16.msra.mxu1 %v5171_v38 }
 0x5e8   :  { %4820 = vmatprep.subr.bf16.mxu1 %v5459_v52 }
 0x5e9   :  { %4815 = vmatpush3.bf16.msra.mxu0 %v5179_v60 }
 0x5ea   :  { %4840 = vmatprep.subr.bf16.mxu0 %v5459_v52 }
 0x61d   :  { %v4672_v26 = vpop.f32.mrb[16].mxu1  ;;  %v4694_v37 = vpop.f32.mrb[20].mxu0 }
 0x61e   :  { %v4673_v28 = vpop.f32.mrb[17].mxu1  ;;  %v4695_v29 = vpop.f32.mrb[21].mxu0 }
 0x61f   :  { %v4674_v30 = vadd.f32 %v4673_v28, %v4672_v26  ;;  %v4696_v31 = vadd.f32 %v4695_v29, %v4694_v37  ;;  %v4675_v32 = vpop.f32.mrb[18].mxu1  ;;  %v4697_v33 = vpop.f32.mrb[22].mxu0 }
 0x620   :  { %v4676_v34 = vpop.f32.mrb[19].mxu1  ;;  %v4698_v35 = vpop.f32.mrb[23].mxu0 }
 0x621   :  { %v3730_v39 = vadd.f32 %v4674_v30, %v4574_v27 }
 0x623   :  { %v3770_v40 = vadd.f32 %v4696_v31, %v3730_v39 }
 0x69d   :  { %v4716_v45 = vpop.f32.mrb[20].mxu1 }
 0x69e   :  { %v4738_v48 = vpop.f32.mrb[24].mxu0  ;;  %v4717_v49 = vpop.f32.mrb[21].mxu1 }
 0x69f   :  { %v4718_v14 = vadd.f32 %v4717_v49, %v4716_v45  ;;  %v4739_v50 = vpop.f32.mrb[25].mxu0  ;;  %v4719_v51 = vpop.f32.mrb[22].mxu1 }
 0x6a0   :  { %v4740_v53 = vadd.f32 %v4739_v50, %v4738_v48  ;;  %v4741_v54 = vpop.f32.mrb[26].mxu0  ;;  %v4720_v55 = vpop.f32.mrb[23].mxu1 }
 0x6a1   :  { %v3810_v56 = vadd.f32 %v4718_v14, %v3770_v40  ;;  %v4742_v57 = vpop.f32.mrb[27].mxu0 }
 0x6a3   :  { %v3850_v58 = vadd.f32 %v4740_v53, %v3810_v56 }
 0x6a5   :  { %v3887_v59 = vpack.c.bf16 %v3850_v58, %v3850_v58 }
 0x6a7   :  { %4797 = vmatmul.mubr.bf16.vlgmr.msra.gmra.mrb[24].mxu1 %v3887_v59 }
 0x6a8   :  { %4821 = vmatpush3.bf16.msra.mxu1 %v5792_v18  ;;  %4836 = vmatprep.mubr.msk.bf16.mxu1 %vm5460_vm2, %v5459_v52 }
 0x6a9   :  { %4822 = vmatprep.subr.bf16.mxu1 %v5459_v52 }
 0x6ac   :  { %4823 = vmatpush3.bf16.msra.mxu1 %v5795_v21 }
 0x6ad   :  { %4824 = vmatprep.subr.bf16.mxu1 %v5459_v52 }
 0x6b0   :  { %4825 = vmatpush3.bf16.msra.mxu1 %v5799_v22 }
 0x6b1   :  { %4826 = vmatprep.subr.bf16.mxu1 %v5459_v52 }
 0x6b4   :  { %4827 = vmatpush3.bf16.msra.mxu1 %v5803_v16 }
 0x6b5   :  { %4828 = vmatprep.subr.bf16.mxu1 %v5459_v52 }
 0x6b8   :  { %4829 = vmatpush3.bf16.msra.mxu1 %v5807_v23  ;;  %v4119_v23 = vand.u32 127, %v187_v3 }
 0x6b9   :  { %4830 = vmatprep.subr.bf16.mxu1 %v5459_v52 }
 0x6ba   :  { %vm4120_vm5 = vcmp.ge.s32.totalorder %v4119_v23, 32 }
 0x6bc   :  { %4831 = vmatpush3.bf16.msra.mxu1 %v5811_v24  ;;  %v4655_v24 = vsel %vm4120_vm5, 1.0, %v5459_v52 }
 0x6bd   :  { %4832 = vmatprep.subr.bf16.mxu1 %v5459_v52 }
 0x6c0   :  { %4833 = vmatpush3.bf16.msra.mxu1 %v5170_v36 }
 0x6c1   :  { %4834 = vmatprep.subr.bf16.mxu1 %v5459_v52 }
 0x6c4   :  { %4835 = vmatpush3.bf16.msra.mxu1 %v5171_v38 }
 0x77a   :  { %v3970_v62 = vpop.f32.mrb[24].mxu1 }
 0x77b   :  { %v3976_v63 = vmul.f32 0.125, %v3970_v62  ;;  %v4798_v0 = vpop.f32.mrb[25].mxu1 }
 0x77c   :  { %v3973_v1 = vpop.f32.mrb[26].mxu1 }
 0x77d   :  { %v3977_v2 = vpack.c.bf16 %v3976_v63, %v3976_v63  ;;  %v4799_v6 = vpop.f32.mrb[27].mxu1 }
 0x77f   :  { %4817 = vmatmul.mubr.bf16.vlgmr.msra.gmra.mrb[28].mxu0 %v3977_v2 }
 0x780   :  { %4841 = vmatpush3.bf16.msra.mxu0 %v5172_v41  ;;  %4856 = vmatprep.mubr.msk.bf16.mxu0 %vm5460_vm2, %v5459_v52 }
 0x781   :  { %4842 = vmatprep.subr.bf16.mxu0 %v5459_v52 }
 0x784   :  { %4843 = vmatpush3.bf16.msra.mxu0 %v5173_v61 }
 0x785   :  { %4844 = vmatprep.subr.bf16.mxu0 %v5459_v52 }
 0x788   :  { %4845 = vmatpush3.bf16.msra.mxu0 %v5174_v42 }
 0x789   :  { %4846 = vmatprep.subr.bf16.mxu0 %v5459_v52 }
 0x78c   :  { %4847 = vmatpush3.bf16.msra.mxu0 %v5175_v43 }
 0x78d   :  { %4848 = vmatprep.subr.bf16.mxu0 %v5459_v52 }
 0x790   :  { %4849 = vmatpush3.bf16.msra.mxu0 %v5176_v44 }
 0x791   :  { %4850 = vmatprep.subr.bf16.mxu0 %v5459_v52 }
 0x794   :  { %4851 = vmatpush3.bf16.msra.mxu0 %v5177_v46 }
 0x795   :  { %4852 = vmatprep.subr.bf16.mxu0 %v5459_v52 }
 0x798   :  { %4853 = vmatpush3.bf16.msra.mxu0 %v5178_v47 }
 0x799   :  { %4854 = vmatprep.subr.bf16.mxu0 %v5459_v52 }
 0x79c   :  { %4855 = vmatpush3.bf16.msra.mxu0 %v5179_v60 }
 0x852   :  { %v4060_v8 = vpop.f32.mrb[28].mxu0 }
 0x853   :  { %v4066_v9 = vsub.f32 %v3850_v58, %v4060_v8  ;;  %v4818_v10 = vpop.f32.mrb[29].mxu0 }
 0x854   :  { %v4063_v11 = vpop.f32.mrb[30].mxu0 }
 0x855   :  { %v4067_v5 = vmul.f32 %v4066_v9, %v4066_v9  ;;  %v4819_v4 = vpop.f32.mrb[31].mxu0 }
 0x857   :  { %v4068_v12 = vpack.c.bf16 %v4067_v5, %v4067_v5 }
 0x859   :  { %4837 = vmatmul.mubr.bf16.vlgmr.msra.gmra.mrb[28].mxu1 %v4068_v12 }
 0x92c   :  { %v4103_v13 = vpop.f32.mrb[28].mxu1 }
 0x92d   :  { %v4109_v15 = vmul.f32 0.14285715, %v4103_v13  ;;  %v4838_v25 = vpop.f32.mrb[29].mxu1 }
 0x92e   :  { %v4106_v17 = vpop.f32.mrb[30].mxu1 }
 0x92f   :  { %5180 = vrsqrt.f32 %v4109_v15  ;;  %v4839_v18 = vpop.f32.mrb[31].mxu1  ;;  %vm4112_vm3 = vcmp.eq.f32.partialorder %v4109_v15, inf  ;;  %v4115_v19 = vand.u32 2147483648, %v4109_v15  ;;  %vm4114_vm4 = vcmp.eq.f32.partialorder %v4109_v15, 0.0 }
 0x939   :  { %v5181_v20 = vpop.eup %5180 }
 0x93a   :  { %v4111_v7 = vmul.f32 %v5181_v20, %v4109_v15 }
 0x93c   :  { %v4113_v21 = vsel %vm4112_vm3, %v4109_v15, %v4111_v7 }
 0x93d   :  { %v4116_v22 = vsel %vm4114_vm4, %v4115_v19, %v4113_v21 }
 0x93e   :  { %v4117_v16 = vpack.c.bf16 %v4116_v22, %v4116_v22 }
 0x940   :  { %4857 = vmatmul.mubr.bf16.vlgmr.msra.gmra.mrb[32].mxu0 %v4117_v16 }
 0xa13   :  { %v4157_v26 = vpop.f32.mrb[32].mxu0 }
 0xa14   :  { %v4158_v37 = vadd.f32 %v4655_v24, %v4157_v26  ;;  %v4858_v27 = vpop.f32.mrb[33].mxu0 }
 0xa15   :  { %v4160_v28 = vpop.f32.mrb[34].mxu0 }
 0xa16   :  { %5182 = vrcp.f32 %v4158_v37  ;;  %v4859_v29 = vpop.f32.mrb[35].mxu0 }
 0xa20   :  { %v5183_v30 = vpop.eup %5182 }
 0xa21   :  { %v4164_v31 = vmul.f32 %v5183_v30, %v4066_v9 }
 0xa23   :  { %4165 = vst [vmem:[#allocation19] sm:$0xff] %v4164_v31 }
 0xa24   :  { %5415 = shalt.err (!%p5412_p0)
}
 0xa25   :  { %s5416_s30 = scalar_lea.hbm %s5886_s15, 128 }
 0xa26   :  { %p5417_p1 = scmp.ne.s32.totalorder %s5886_s15, %s5416_s30  ;;  %p5420_p2 = scmp.lt.u32.totalorder %s5416_s30, %s5886_s15 }
 0xa28   :  { %p5422_p3 = pnand %p5420_p2, %p5417_p1 }
 0xa2a   :  { %5425 = shalt.err (!%p5422_p3)
}
 0xa2b   :  { %4175 = dma.vmem_to_hbm [thread:$0]  %s4173_s25, 128, %s5886_s15, [#allocation4]  }
 0xa2c   :  { %5438 = dma.done.wait [#allocation4], 128  }
 0xa2d   :  { %5439 = vsyncadd [#allocation4], 4294967168 }
 0xa2e   :  { %4179 = vsyncpa [#allocation3], 1 }
 0xa2f   :  { %4180 = vsyncpa [#allocation6], 1 }
 0xa30   :  { %4181 = vsyncpa [#allocation9], 1 }
 0xa31   :  { %4182 = vsyncpa [#allocation12], 1 }
 0xa32   :  { %4183 = vsyncpa [#allocation15], 1 }
 0xa33   :  { %4184 = vsyncpa [#allocation18], 1 }
 0xa34   :  { %4185 = vsyncpa [#allocation4], 1 }

</bundles_post_ra>
